<compile_context>
chip_gen: v7x
topology: tpu7x:2x2x1
jax: 0.10.0
libtpu: 0.0.40
codegen_flags: <defaults>
</compile_context>

<pallas_src>
import jax
import jax.numpy as jnp
from jax.experimental import pallas as pl
from jax.experimental.pallas import tpu as pltpu

_NEG = -1e9  # padding value for transition / start / end scores (exp -> 0 in f32)


def _round_up(x, m):
    return (x + m - 1) // m * m


def _logz_kernel(emit_ref, len_ref, exp_trans_ref, strans_ref, etrans_ref,
                 tmax_ref, out_ref, alpha_ref):
    """Runs Tt timesteps of the CRF forward (alpha) recursion for one batch tile.

    emit_ref     : (Tt, TB, Npad)  emission scores for this time block
    len_ref      : (TB, 1)         per-sequence lengths (float32), resident
    exp_trans_ref: (Npad, Npad)    exp(trans - max(trans)), resident
    strans_ref   : (1, Npad)       start transitions, resident
    etrans_ref   : (1, Npad)       end transitions, resident
    tmax_ref     : (1, 1)          max(trans) (the exp-space shift), resident
    out_ref      : (TB, 1)         per-sequence logZ (written on the last time block)
    alpha_ref    : (TB, Npad)      VMEM scratch carrying the forward variables
    """
    t_blk = pl.program_id(1)
    tt = emit_ref.shape[0]

    @pl.when(t_blk == 0)
    def _():
        # Placeholder init; the real init (strans + emit[0]) happens at t == 0 below.
        alpha_ref[...] = jnp.zeros_like(alpha_ref)

    # Hoist all resident operands out of the per-timestep loop (no re-broadcast).
    lengths = len_ref[...]                # (TB, 1)
    exp_trans = exp_trans_ref[...]        # (Npad, Npad)
    strans = strans_ref[...]              # (1, Npad)
    tmax = tmax_ref[...]                  # (1, 1)

    def step(i, alpha):
        t = t_blk * tt + i                                     # global timestep
        emit_t = emit_ref[i].astype(jnp.float32)               # (TB, Npad)
        # Scaled-forward recursion:
        #   logsumexp_i(alpha_i + trans_ij)
        #     = m + tmax + log( exp(alpha - m) @ exp(trans - tmax) )   (MXU matmul)
        # Assumes |trans| stays within the f32 exp range after the max-shift
        # (true for typical CRF transition magnitudes).
        m = jnp.max(alpha, axis=-1, keepdims=True)             # (TB, 1)
        p = jnp.exp(alpha - m)                                 # (TB, Npad)
        s = jnp.dot(p, exp_trans,
                    preferred_element_type=jnp.float32,
                    precision=jax.lax.Precision.HIGHEST)       # (TB, Npad)
        scores = (m + tmax) + jnp.log(s) + emit_t
        valid = lengths > t.astype(jnp.float32)                # (TB, 1)
        new_alpha = jnp.where(valid, scores, alpha)
        # t == 0: unconditional init alpha = strans + emit[0] (matches reference).
        new_alpha = jnp.where(t == 0, strans + emit_t, new_alpha)
        return new_alpha

    alpha = jax.lax.fori_loop(0, tt, step, alpha_ref[...], unroll=True)
    alpha_ref[...] = alpha

    @pl.when(t_blk == pl.num_programs(1) - 1)
    def _():
        final = alpha + etrans_ref[...]                        # (TB, Npad)
        m = jnp.max(final, axis=-1, keepdims=True)
        out_ref[...] = m + jnp.log(
            jnp.sum(jnp.exp(final - m), axis=-1, keepdims=True))


def crf_logz_pallas(emit, mask, trans, strans, etrans):
    """Log partition function (summed over the batch)."""
    T, B, N = emit.shape

    n_pad = _round_up(N, 128)                       # lane axis
    tb = min(_round_up(B, 8), 128)                  # batch tile (sublane axis)
    b_pad = _round_up(B, tb)
    esize = jnp.dtype(emit.dtype).itemsize
    # Keep each (double-buffered) emit block small (<= ~4 MiB), cap at 16 steps;
    # fits comfortably in v7x's 64 MiB VMEM as well as v5e/v6e's 128 MiB.
    tt = max(1, min(T, 16, (4 * 1024 * 1024) // (tb * n_pad * esize)))
    t_pad = _round_up(T, tt)

    # Pad: tags to 128 lanes, batch to the tile size, time to a multiple of Tt.
    # Padded timesteps / batch rows are neutralized by the length vector; padded
    # tags get -1e9 scores (exp -> 0, so they never contribute).
    emit_p = jnp.pad(emit, ((0, t_pad - T), (0, b_pad - B), (0, n_pad - N)))
    lengths = jnp.sum(mask.astype(jnp.int32), axis=0).astype(jnp.float32)
    len_p = jnp.pad(lengths, (0, b_pad - B)).reshape(b_pad, 1)

    trans_f = trans.astype(jnp.float32)
    tmax = jnp.max(trans_f).reshape(1, 1)
    trans_p = jnp.pad(trans_f, ((0, n_pad - N), (0, n_pad - N)),
                      constant_values=_NEG)
    exp_trans = jnp.exp(trans_p - tmax)             # in (0, 1]; padded entries -> 0
    strans_p = jnp.pad(strans.astype(jnp.float32), (0, n_pad - N),
                       constant_values=_NEG).reshape(1, n_pad)
    etrans_p = jnp.pad(etrans.astype(jnp.float32), (0, n_pad - N),
                       constant_values=_NEG).reshape(1, n_pad)

    grid = (b_pad // tb, t_pad // tt)
    out = pl.pallas_call(
        _logz_kernel,
        out_shape=jax.ShapeDtypeStruct((b_pad, 1), jnp.float32),
        grid_spec=pltpu.PrefetchScalarGridSpec(
            num_scalar_prefetch=0,
            grid=grid,
            in_specs=[
                pl.BlockSpec((tt, tb, n_pad), lambda b, t: (t, b, 0)),  # emit block
                pl.BlockSpec((tb, 1), lambda b, t: (b, 0)),             # lengths
                pl.BlockSpec((n_pad, n_pad), lambda b, t: (0, 0)),      # exp(trans)
                pl.BlockSpec((1, n_pad), lambda b, t: (0, 0)),          # strans
                pl.BlockSpec((1, n_pad), lambda b, t: (0, 0)),          # etrans
                pl.BlockSpec((1, 1), lambda b, t: (0, 0)),              # max(trans)
            ],
            out_specs=pl.BlockSpec((tb, 1), lambda b, t: (b, 0)),
            scratch_shapes=[pltpu.VMEM((tb, n_pad), jnp.float32)],
        ),
        compiler_params=pltpu.CompilerParams(
            dimension_semantics=("parallel", "arbitrary")),
    )(emit_p, len_p, exp_trans, strans_p, etrans_p, tmax)
    return jnp.sum(out[:B, 0])


def crf_score(emit, target, mask, trans, strans, etrans):
    """Gold-path score. Pure gathers / tiny sums -> plain JAX glue."""
    T, B, N = emit.shape
    scores = jnp.zeros((T, B), jnp.float32)
    scores = scores.at[1:].add(trans[target[:-1], target[1:]])
    scores = scores + jnp.take_along_axis(emit, target[:, :, None], axis=2)[..., 0]
    score = jnp.sum(jnp.where(mask, scores, 0.0))
    ends = jnp.sum(mask.astype(jnp.int32), axis=0) - 1
    score = score + jnp.sum(strans[target[0]])
    end_tags = jnp.take_along_axis(target, ends[None, :], axis=0)[0]
    score = score + jnp.sum(etrans[end_tags])
    return score


def crf_forward(emit, target, mask, trans, strans, etrans):
    """(logZ - gold_score) / B, matching CRF.forward in the PyTorch module."""
    T, B, N = emit.shape
    logZ = crf_logz_pallas(emit, mask, trans, strans, etrans)
    score = crf_score(emit, target, mask, trans, strans, etrans)
    return (logZ - score) / B


def crf_logz_ref(emit, mask, trans, strans, etrans):
    """Pure-JAX reference for the forward recursion (correctness check)."""
    T, B, N = emit.shape
    emit = emit.astype(jnp.float32)
    alpha = strans + emit[0]
    for i in range(1, T):
        x = trans[None, :, :] + emit[i][:, None, :] + alpha[:, :, None]
        scores = jax.scipy.special.logsumexp(x, axis=1)
        alpha = jnp.where(mask[i][:, None], scores, alpha)
    return jnp.sum(jax.scipy.special.logsumexp(alpha + etrans, axis=1))


def _run_case(key, T, B, n_tags, lengths):
    std = (1.0 / n_tags) ** 0.5
    k_tr, k_st, k_et, k_em, k_tg = jax.random.split(key, 5)
    trans = std * jax.random.normal(k_tr, (n_tags, n_tags), jnp.float32)
    strans = std * jax.random.normal(k_st, (n_tags,), jnp.float32)
    etrans = std * jax.random.normal(k_et, (n_tags,), jnp.float32)

    emit = jax.random.normal(k_em, (T, B, n_tags), jnp.float32)
    target = jax.random.randint(k_tg, (T, B), 0, n_tags, jnp.int32)
    lengths = jnp.array(lengths, jnp.int32)
    mask = (jnp.arange(T)[:, None] < lengths[None, :])          # (T, B) bool, contiguous

    loss = crf_forward(emit, target, mask, trans, strans, etrans)
    jax.block_until_ready(loss)

    logz_k = crf_logz_pallas(emit, mask, trans, strans, etrans)
    logz_r = crf_logz_ref(emit, mask, trans, strans, etrans)
    assert jnp.allclose(logz_k, logz_r, rtol=1e-4, atol=1e-4), (logz_k, logz_r)
    return loss


if __name__ == "__main__":
    key = jax.random.PRNGKey(0)
    k1, k2 = jax.random.split(key)

    # Small config matching the module's intended shapes.
    _run_case(k1, T=8, B=4, n_tags=8, lengths=[8, 6, 3, 1])
    # Non-aligned config exercising tag / batch / time padding and multi-block grid.
    _run_case(k2, T=20, B=5, n_tags=20, lengths=[20, 17, 9, 4, 1])

    # TODO(synk): viterbi / viterbi_tags (top-k decode with Python-level backtracking
    # and ragged outputs) are inference utilities not part of forward() and are not
    # translated to Pallas.
    print("KERNEL_OK")
</pallas_src>

<mosaic_0001>
module attributes {stable_mosaic.version = 11 : i64} {
  func.func @_logz_kernel(%arg0: i32, %arg1: i32, %arg2: memref<8x8x128xf32, #tpu.memory_space<vmem>>, %arg3: memref<8x1xf32, #tpu.memory_space<vmem>>, %arg4: memref<128x128xf32, #tpu.memory_space<vmem>>, %arg5: memref<1x128xf32, #tpu.memory_space<vmem>>, %arg6: memref<1x128xf32, #tpu.memory_space<vmem>>, %arg7: memref<1x1xf32, #tpu.memory_space<vmem>>, %arg8: memref<8x1xf32, #tpu.memory_space<vmem>>, %arg9: memref<8x128xf32, #tpu.memory_space<vmem>>) attributes {dimension_semantics = [#tpu.dimension_semantics<parallel>, #tpu.dimension_semantics<arbitrary>], iteration_bounds = array<i64: 1, 1>, scalar_prefetch = 0 : i64, scratch_operands = 1 : i64, tpu.core_type = #tpu.core_type<tc>, window_params = [{transform_indices = @transform_0, window_bounds = array<i64: 8, 8, 128>}, {transform_indices = @transform_1, window_bounds = array<i64: 8, 1>}, {pipeline_mode = #tpu.pipeline_mode<synchronous>, transform_indices = @transform_2, window_bounds = array<i64: 128, 128>}, {pipeline_mode = #tpu.pipeline_mode<synchronous>, transform_indices = @transform_3, window_bounds = array<i64: 1, 128>}, {pipeline_mode = #tpu.pipeline_mode<synchronous>, transform_indices = @transform_4, window_bounds = array<i64: 1, 128>}, {pipeline_mode = #tpu.pipeline_mode<synchronous>, transform_indices = @transform_5, window_bounds = array<i64: 1, 1>}, {transform_indices = @transform_6, window_bounds = array<i64: 8, 1>}]} {
    %c0_i32 = arith.constant 0 : i32
    %0 = arith.cmpi eq, %arg1, %c0_i32 : i32
    %1 = arith.extui %0 : i1 to i32
    %c0_i32_0 = arith.constant 0 : i32
    %2 = arith.cmpi ne, %1, %c0_i32_0 : i32
    scf.if %2 {
      %cst_62 = arith.constant 0.000000e+00 : f32
      %228 = vector.broadcast %cst_62 : f32 to vector<8x128xf32>
      %c0_63 = arith.constant 0 : index
      %c0_64 = arith.constant 0 : index
      %229 = vector.load %arg9[%c0_63, %c0_64] : memref<8x128xf32, #tpu.memory_space<vmem>>, vector<8x128xf32>
      tpu.vector_store %arg9[%c0_63, %c0_64], %228 {strides = array<i32>} : memref<8x128xf32, #tpu.memory_space<vmem>>, vector<8x128xf32>,
    } else {
    }
    %c0 = arith.constant 0 : index
    %c0_1 = arith.constant 0 : index
    %3 = vector.load %arg3[%c0, %c0_1] : memref<8x1xf32, #tpu.memory_space<vmem>>, vector<8x1xf32>
    %c0_2 = arith.constant 0 : index
    %c0_3 = arith.constant 0 : index
    %4 = vector.load %arg4[%c0_2, %c0_3] : memref<128x128xf32, #tpu.memory_space<vmem>>, vector<128x128xf32>
    %c0_4 = arith.constant 0 : index
    %c0_5 = arith.constant 0 : index
    %5 = vector.load %arg5[%c0_4, %c0_5] : memref<1x128xf32, #tpu.memory_space<vmem>>, vector<1x128xf32>
    %c0_6 = arith.constant 0 : index
    %c0_7 = arith.constant 0 : index
    %6 = vector.load %arg7[%c0_6, %c0_7] : memref<1x1xf32, #tpu.memory_space<vmem>>, vector<1x1xf32>
    %c0_8 = arith.constant 0 : index
    %c0_9 = arith.constant 0 : index
    %7 = vector.load %arg9[%c0_8, %c0_9] : memref<8x128xf32, #tpu.memory_space<vmem>>, vector<8x128xf32>
    %c0_i32_10 = arith.constant 0 : i32
    %c8_i32 = arith.constant 8 : i32
    %8 = arith.muli %arg1, %c8_i32 : i32
    %9 = arith.addi %8, %c0_i32_10 : i32
    %10 = arith.index_cast %c0_i32_10 : i32 to index
    %c0_11 = arith.constant 0 : index
    %c0_12 = arith.constant 0 : index
    %11 = vector.load %arg2[%10, %c0_11, %c0_12] : memref<8x8x128xf32, #tpu.memory_space<vmem>>, vector<1x8x128xf32>
    %12 = vector.shape_cast %11 : vector<1x8x128xf32> to vector<8x128xf32>
    %cst = arith.constant dense<0xFF800000> : vector<8xf32>
    %13 = vector.multi_reduction <maximumf>, %7, %cst [1] : vector<8x128xf32> to vector<8xf32>
    %14 = vector.shape_cast %13 : vector<8xf32> to vector<8x1xf32>
    %15 = vector.broadcast %14 : vector<8x1xf32> to vector<8x128xf32>
    %16 = arith.subf %7, %15 : vector<8x128xf32>
    %17 = math.exp %16 : vector<8x128xf32>
    %cst_13 = arith.constant dense<0.000000e+00> : vector<8x128xf32>
    %18 = tpu.matmul %17, %4, %cst_13 {dimension_numbers = #tpu.dot_dimension_numbers<[1], [0], [0], [1], [0, 0, 1, 1], [], []>, precision = #tpu.contract_precision<fp32>} : vector<8x128xf32>, vector<128x128xf32>, vector<8x128xf32> -> vector<8x128xf32>
    %19 = vector.broadcast %6 : vector<1x1xf32> to vector<8x1xf32>
    %20 = arith.addf %14, %19 : vector<8x1xf32>
    %21 = math.log %18 : vector<8x128xf32>
    %22 = vector.broadcast %20 : vector<8x1xf32> to vector<8x128xf32>
    %23 = arith.addf %22, %21 : vector<8x128xf32>
    %24 = arith.addf %23, %12 : vector<8x128xf32>
    %25 = arith.sitofp %9 : i32 to f32
    %26 = vector.broadcast %25 : f32 to vector<8x1xf32>
    %27 = arith.cmpf ogt, %3, %26 : vector<8x1xf32>
    %28 = vector.shape_cast %27 : vector<8x1xi1> to vector<8x1xi1>
    %29 = vector.broadcast %28 : vector<8x1xi1> to vector<8x128xi1>
    %30 = arith.select %29, %24, %7 : vector<8x128xi1>, vector<8x128xf32>
    %c0_i32_14 = arith.constant 0 : i32
    %31 = arith.cmpi eq, %9, %c0_i32_14 : i32
    %32 = vector.broadcast %5 : vector<1x128xf32> to vector<8x128xf32>
    %33 = arith.addf %32, %12 : vector<8x128xf32>
    %34 = arith.select %31, %33, %30 : vector<8x128xf32>
    %c1_i32 = arith.constant 1 : i32
    %c8_i32_15 = arith.constant 8 : i32
    %35 = arith.muli %arg1, %c8_i32_15 : i32
    %36 = arith.addi %35, %c1_i32 : i32
    %37 = arith.index_cast %c1_i32 : i32 to index
    %c0_16 = arith.constant 0 : index
    %c0_17 = arith.constant 0 : index
    %38 = vector.load %arg2[%37, %c0_16, %c0_17] : memref<8x8x128xf32, #tpu.memory_space<vmem>>, vector<1x8x128xf32>
    %39 = vector.shape_cast %38 : vector<1x8x128xf32> to vector<8x128xf32>
    %cst_18 = arith.constant dense<0xFF800000> : vector<8xf32>
    %40 = vector.multi_reduction <maximumf>, %34, %cst_18 [1] : vector<8x128xf32> to vector<8xf32>
    %41 = vector.shape_cast %40 : vector<8xf32> to vector<8x1xf32>
    %42 = vector.broadcast %41 : vector<8x1xf32> to vector<8x128xf32>
    %43 = arith.subf %34, %42 : vector<8x128xf32>
    %44 = math.exp %43 : vector<8x128xf32>
    %cst_19 = arith.constant dense<0.000000e+00> : vector<8x128xf32>
    %45 = tpu.matmul %44, %4, %cst_19 {dimension_numbers = #tpu.dot_dimension_numbers<[1], [0], [0], [1], [0, 0, 1, 1], [], []>, precision = #tpu.contract_precision<fp32>} : vector<8x128xf32>, vector<128x128xf32>, vector<8x128xf32> -> vector<8x128xf32>
    %46 = vector.broadcast %6 : vector<1x1xf32> to vector<8x1xf32>
    %47 = arith.addf %41, %46 : vector<8x1xf32>
    %48 = math.log %45 : vector<8x128xf32>
    %49 = vector.broadcast %47 : vector<8x1xf32> to vector<8x128xf32>
    %50 = arith.addf %49, %48 : vector<8x128xf32>
    %51 = arith.addf %50, %39 : vector<8x128xf32>
    %52 = arith.sitofp %36 : i32 to f32
    %53 = vector.broadcast %52 : f32 to vector<8x1xf32>
    %54 = arith.cmpf ogt, %3, %53 : vector<8x1xf32>
    %55 = vector.shape_cast %54 : vector<8x1xi1> to vector<8x1xi1>
    %56 = vector.broadcast %55 : vector<8x1xi1> to vector<8x128xi1>
    %57 = arith.select %56, %51, %34 : vector<8x128xi1>, vector<8x128xf32>
    %c0_i32_20 = arith.constant 0 : i32
    %58 = arith.cmpi eq, %36, %c0_i32_20 : i32
    %59 = vector.broadcast %5 : vector<1x128xf32> to vector<8x128xf32>
    %60 = arith.addf %59, %39 : vector<8x128xf32>
    %61 = arith.select %58, %60, %57 : vector<8x128xf32>
    %c2_i32 = arith.constant 2 : i32
    %c8_i32_21 = arith.constant 8 : i32
    %62 = arith.muli %arg1, %c8_i32_21 : i32
    %63 = arith.addi %62, %c2_i32 : i32
    %64 = arith.index_cast %c2_i32 : i32 to index
    %c0_22 = arith.constant 0 : index
    %c0_23 = arith.constant 0 : index
    %65 = vector.load %arg2[%64, %c0_22, %c0_23] : memref<8x8x128xf32, #tpu.memory_space<vmem>>, vector<1x8x128xf32>
    %66 = vector.shape_cast %65 : vector<1x8x128xf32> to vector<8x128xf32>
    %cst_24 = arith.constant dense<0xFF800000> : vector<8xf32>
    %67 = vector.multi_reduction <maximumf>, %61, %cst_24 [1] : vector<8x128xf32> to vector<8xf32>
    %68 = vector.shape_cast %67 : vector<8xf32> to vector<8x1xf32>
    %69 = vector.broadcast %68 : vector<8x1xf32> to vector<8x128xf32>
    %70 = arith.subf %61, %69 : vector<8x128xf32>
    %71 = math.exp %70 : vector<8x128xf32>
    %cst_25 = arith.constant dense<0.000000e+00> : vector<8x128xf32>
    %72 = tpu.matmul %71, %4, %cst_25 {dimension_numbers = #tpu.dot_dimension_numbers<[1], [0], [0], [1], [0, 0, 1, 1], [], []>, precision = #tpu.contract_precision<fp32>} : vector<8x128xf32>, vector<128x128xf32>, vector<8x128xf32> -> vector<8x128xf32>
    %73 = vector.broadcast %6 : vector<1x1xf32> to vector<8x1xf32>
    %74 = arith.addf %68, %73 : vector<8x1xf32>
    %75 = math.log %72 : vector<8x128xf32>
    %76 = vector.broadcast %74 : vector<8x1xf32> to vector<8x128xf32>
    %77 = arith.addf %76, %75 : vector<8x128xf32>
    %78 = arith.addf %77, %66 : vector<8x128xf32>
    %79 = arith.sitofp %63 : i32 to f32
    %80 = vector.broadcast %79 : f32 to vector<8x1xf32>
    %81 = arith.cmpf ogt, %3, %80 : vector<8x1xf32>
    %82 = vector.shape_cast %81 : vector<8x1xi1> to vector<8x1xi1>
    %83 = vector.broadcast %82 : vector<8x1xi1> to vector<8x128xi1>
    %84 = arith.select %83, %78, %61 : vector<8x128xi1>, vector<8x128xf32>
    %c0_i32_26 = arith.constant 0 : i32
    %85 = arith.cmpi eq, %63, %c0_i32_26 : i32
    %86 = vector.broadcast %5 : vector<1x128xf32> to vector<8x128xf32>
    %87 = arith.addf %86, %66 : vector<8x128xf32>
    %88 = arith.select %85, %87, %84 : vector<8x128xf32>
    %c3_i32 = arith.constant 3 : i32
    %c8_i32_27 = arith.constant 8 : i32
    %89 = arith.muli %arg1, %c8_i32_27 : i32
    %90 = arith.addi %89, %c3_i32 : i32
    %91 = arith.index_cast %c3_i32 : i32 to index
    %c0_28 = arith.constant 0 : index
    %c0_29 = arith.constant 0 : index
    %92 = vector.load %arg2[%91, %c0_28, %c0_29] : memref<8x8x128xf32, #tpu.memory_space<vmem>>, vector<1x8x128xf32>
    %93 = vector.shape_cast %92 : vector<1x8x128xf32> to vector<8x128xf32>
    %cst_30 = arith.constant dense<0xFF800000> : vector<8xf32>
    %94 = vector.multi_reduction <maximumf>, %88, %cst_30 [1] : vector<8x128xf32> to vector<8xf32>
    %95 = vector.shape_cast %94 : vector<8xf32> to vector<8x1xf32>
    %96 = vector.broadcast %95 : vector<8x1xf32> to vector<8x128xf32>
    %97 = arith.subf %88, %96 : vector<8x128xf32>
    %98 = math.exp %97 : vector<8x128xf32>
    %cst_31 = arith.constant dense<0.000000e+00> : vector<8x128xf32>
    %99 = tpu.matmul %98, %4, %cst_31 {dimension_numbers = #tpu.dot_dimension_numbers<[1], [0], [0], [1], [0, 0, 1, 1], [], []>, precision = #tpu.contract_precision<fp32>} : vector<8x128xf32>, vector<128x128xf32>, vector<8x128xf32> -> vector<8x128xf32>
    %100 = vector.broadcast %6 : vector<1x1xf32> to vector<8x1xf32>
    %101 = arith.addf %95, %100 : vector<8x1xf32>
    %102 = math.log %99 : vector<8x128xf32>
    %103 = vector.broadcast %101 : vector<8x1xf32> to vector<8x128xf32>
    %104 = arith.addf %103, %102 : vector<8x128xf32>
    %105 = arith.addf %104, %93 : vector<8x128xf32>
    %106 = arith.sitofp %90 : i32 to f32
    %107 = vector.broadcast %106 : f32 to vector<8x1xf32>
    %108 = arith.cmpf ogt, %3, %107 : vector<8x1xf32>
    %109 = vector.shape_cast %108 : vector<8x1xi1> to vector<8x1xi1>
    %110 = vector.broadcast %109 : vector<8x1xi1> to vector<8x128xi1>
    %111 = arith.select %110, %105, %88 : vector<8x128xi1>, vector<8x128xf32>
    %c0_i32_32 = arith.constant 0 : i32
    %112 = arith.cmpi eq, %90, %c0_i32_32 : i32
    %113 = vector.broadcast %5 : vector<1x128xf32> to vector<8x128xf32>
    %114 = arith.addf %113, %93 : vector<8x128xf32>
    %115 = arith.select %112, %114, %111 : vector<8x128xf32>
    %c4_i32 = arith.constant 4 : i32
    %c8_i32_33 = arith.constant 8 : i32
    %116 = arith.muli %arg1, %c8_i32_33 : i32
    %117 = arith.addi %116, %c4_i32 : i32
    %118 = arith.index_cast %c4_i32 : i32 to index
    %c0_34 = arith.constant 0 : index
    %c0_35 = arith.constant 0 : index
    %119 = vector.load %arg2[%118, %c0_34, %c0_35] : memref<8x8x128xf32, #tpu.memory_space<vmem>>, vector<1x8x128xf32>
    %120 = vector.shape_cast %119 : vector<1x8x128xf32> to vector<8x128xf32>
    %cst_36 = arith.constant dense<0xFF800000> : vector<8xf32>
    %121 = vector.multi_reduction <maximumf>, %115, %cst_36 [1] : vector<8x128xf32> to vector<8xf32>
    %122 = vector.shape_cast %121 : vector<8xf32> to vector<8x1xf32>
    %123 = vector.broadcast %122 : vector<8x1xf32> to vector<8x128xf32>
    %124 = arith.subf %115, %123 : vector<8x128xf32>
    %125 = math.exp %124 : vector<8x128xf32>
    %cst_37 = arith.constant dense<0.000000e+00> : vector<8x128xf32>
    %126 = tpu.matmul %125, %4, %cst_37 {dimension_numbers = #tpu.dot_dimension_numbers<[1], [0], [0], [1], [0, 0, 1, 1], [], []>, precision = #tpu.contract_precision<fp32>} : vector<8x128xf32>, vector<128x128xf32>, vector<8x128xf32> -> vector<8x128xf32>
    %127 = vector.broadcast %6 : vector<1x1xf32> to vector<8x1xf32>
    %128 = arith.addf %122, %127 : vector<8x1xf32>
    %129 = math.log %126 : vector<8x128xf32>
    %130 = vector.broadcast %128 : vector<8x1xf32> to vector<8x128xf32>
    %131 = arith.addf %130, %129 : vector<8x128xf32>
    %132 = arith.addf %131, %120 : vector<8x128xf32>
    %133 = arith.sitofp %117 : i32 to f32
    %134 = vector.broadcast %133 : f32 to vector<8x1xf32>
    %135 = arith.cmpf ogt, %3, %134 : vector<8x1xf32>
    %136 = vector.shape_cast %135 : vector<8x1xi1> to vector<8x1xi1>
    %137 = vector.broadcast %136 : vector<8x1xi1> to vector<8x128xi1>
    %138 = arith.select %137, %132, %115 : vector<8x128xi1>, vector<8x128xf32>
    %c0_i32_38 = arith.constant 0 : i32
    %139 = arith.cmpi eq, %117, %c0_i32_38 : i32
    %140 = vector.broadcast %5 : vector<1x128xf32> to vector<8x128xf32>
    %141 = arith.addf %140, %120 : vector<8x128xf32>
    %142 = arith.select %139, %141, %138 : vector<8x128xf32>
    %c5_i32 = arith.constant 5 : i32
    %c8_i32_39 = arith.constant 8 : i32
    %143 = arith.muli %arg1, %c8_i32_39 : i32
    %144 = arith.addi %143, %c5_i32 : i32
    %145 = arith.index_cast %c5_i32 : i32 to index
    %c0_40 = arith.constant 0 : index
    %c0_41 = arith.constant 0 : index
    %146 = vector.load %arg2[%145, %c0_40, %c0_41] : memref<8x8x128xf32, #tpu.memory_space<vmem>>, vector<1x8x128xf32>
    %147 = vector.shape_cast %146 : vector<1x8x128xf32> to vector<8x128xf32>
    %cst_42 = arith.constant dense<0xFF800000> : vector<8xf32>
    %148 = vector.multi_reduction <maximumf>, %142, %cst_42 [1] : vector<8x128xf32> to vector<8xf32>
    %149 = vector.shape_cast %148 : vector<8xf32> to vector<8x1xf32>
    %150 = vector.broadcast %149 : vector<8x1xf32> to vector<8x128xf32>
    %151 = arith.subf %142, %150 : vector<8x128xf32>
    %152 = math.exp %151 : vector<8x128xf32>
    %cst_43 = arith.constant dense<0.000000e+00> : vector<8x128xf32>
    %153 = tpu.matmul %152, %4, %cst_43 {dimension_numbers = #tpu.dot_dimension_numbers<[1], [0], [0], [1], [0, 0, 1, 1], [], []>, precision = #tpu.contract_precision<fp32>} : vector<8x128xf32>, vector<128x128xf32>, vector<8x128xf32> -> vector<8x128xf32>
    %154 = vector.broadcast %6 : vector<1x1xf32> to vector<8x1xf32>
    %155 = arith.addf %149, %154 : vector<8x1xf32>
    %156 = math.log %153 : vector<8x128xf32>
    %157 = vector.broadcast %155 : vector<8x1xf32> to vector<8x128xf32>
    %158 = arith.addf %157, %156 : vector<8x128xf32>
    %159 = arith.addf %158, %147 : vector<8x128xf32>
    %160 = arith.sitofp %144 : i32 to f32
    %161 = vector.broadcast %160 : f32 to vector<8x1xf32>
    %162 = arith.cmpf ogt, %3, %161 : vector<8x1xf32>
    %163 = vector.shape_cast %162 : vector<8x1xi1> to vector<8x1xi1>
    %164 = vector.broadcast %163 : vector<8x1xi1> to vector<8x128xi1>
    %165 = arith.select %164, %159, %142 : vector<8x128xi1>, vector<8x128xf32>
    %c0_i32_44 = arith.constant 0 : i32
    %166 = arith.cmpi eq, %144, %c0_i32_44 : i32
    %167 = vector.broadcast %5 : vector<1x128xf32> to vector<8x128xf32>
    %168 = arith.addf %167, %147 : vector<8x128xf32>
    %169 = arith.select %166, %168, %165 : vector<8x128xf32>
    %c6_i32 = arith.constant 6 : i32
    %c8_i32_45 = arith.constant 8 : i32
    %170 = arith.muli %arg1, %c8_i32_45 : i32
    %171 = arith.addi %170, %c6_i32 : i32
    %172 = arith.index_cast %c6_i32 : i32 to index
    %c0_46 = arith.constant 0 : index
    %c0_47 = arith.constant 0 : index
    %173 = vector.load %arg2[%172, %c0_46, %c0_47] : memref<8x8x128xf32, #tpu.memory_space<vmem>>, vector<1x8x128xf32>
    %174 = vector.shape_cast %173 : vector<1x8x128xf32> to vector<8x128xf32>
    %cst_48 = arith.constant dense<0xFF800000> : vector<8xf32>
    %175 = vector.multi_reduction <maximumf>, %169, %cst_48 [1] : vector<8x128xf32> to vector<8xf32>
    %176 = vector.shape_cast %175 : vector<8xf32> to vector<8x1xf32>
    %177 = vector.broadcast %176 : vector<8x1xf32> to vector<8x128xf32>
    %178 = arith.subf %169, %177 : vector<8x128xf32>
    %179 = math.exp %178 : vector<8x128xf32>
    %cst_49 = arith.constant dense<0.000000e+00> : vector<8x128xf32>
    %180 = tpu.matmul %179, %4, %cst_49 {dimension_numbers = #tpu.dot_dimension_numbers<[1], [0], [0], [1], [0, 0, 1, 1], [], []>, precision = #tpu.contract_precision<fp32>} : vector<8x128xf32>, vector<128x128xf32>, vector<8x128xf32> -> vector<8x128xf32>
    %181 = vector.broadcast %6 : vector<1x1xf32> to vector<8x1xf32>
    %182 = arith.addf %176, %181 : vector<8x1xf32>
    %183 = math.log %180 : vector<8x128xf32>
    %184 = vector.broadcast %182 : vector<8x1xf32> to vector<8x128xf32>
    %185 = arith.addf %184, %183 : vector<8x128xf32>
    %186 = arith.addf %185, %174 : vector<8x128xf32>
    %187 = arith.sitofp %171 : i32 to f32
    %188 = vector.broadcast %187 : f32 to vector<8x1xf32>
    %189 = arith.cmpf ogt, %3, %188 : vector<8x1xf32>
    %190 = vector.shape_cast %189 : vector<8x1xi1> to vector<8x1xi1>
    %191 = vector.broadcast %190 : vector<8x1xi1> to vector<8x128xi1>
    %192 = arith.select %191, %186, %169 : vector<8x128xi1>, vector<8x128xf32>
    %c0_i32_50 = arith.constant 0 : i32
    %193 = arith.cmpi eq, %171, %c0_i32_50 : i32
    %194 = vector.broadcast %5 : vector<1x128xf32> to vector<8x128xf32>
    %195 = arith.addf %194, %174 : vector<8x128xf32>
    %196 = arith.select %193, %195, %192 : vector<8x128xf32>
    %c7_i32 = arith.constant 7 : i32
    %c8_i32_51 = arith.constant 8 : i32
    %197 = arith.muli %arg1, %c8_i32_51 : i32
    %198 = arith.addi %197, %c7_i32 : i32
    %199 = arith.index_cast %c7_i32 : i32 to index
    %c0_52 = arith.constant 0 : index
    %c0_53 = arith.constant 0 : index
    %200 = vector.load %arg2[%199, %c0_52, %c0_53] : memref<8x8x128xf32, #tpu.memory_space<vmem>>, vector<1x8x128xf32>
    %201 = vector.shape_cast %200 : vector<1x8x128xf32> to vector<8x128xf32>
    %cst_54 = arith.constant dense<0xFF800000> : vector<8xf32>
    %202 = vector.multi_reduction <maximumf>, %196, %cst_54 [1] : vector<8x128xf32> to vector<8xf32>
    %203 = vector.shape_cast %202 : vector<8xf32> to vector<8x1xf32>
    %204 = vector.broadcast %203 : vector<8x1xf32> to vector<8x128xf32>
    %205 = arith.subf %196, %204 : vector<8x128xf32>
    %206 = math.exp %205 : vector<8x128xf32>
    %cst_55 = arith.constant dense<0.000000e+00> : vector<8x128xf32>
    %207 = tpu.matmul %206, %4, %cst_55 {dimension_numbers = #tpu.dot_dimension_numbers<[1], [0], [0], [1], [0, 0, 1, 1], [], []>, precision = #tpu.contract_precision<fp32>} : vector<8x128xf32>, vector<128x128xf32>, vector<8x128xf32> -> vector<8x128xf32>
    %208 = vector.broadcast %6 : vector<1x1xf32> to vector<8x1xf32>
    %209 = arith.addf %203, %208 : vector<8x1xf32>
    %210 = math.log %207 : vector<8x128xf32>
    %211 = vector.broadcast %209 : vector<8x1xf32> to vector<8x128xf32>
    %212 = arith.addf %211, %210 : vector<8x128xf32>
    %213 = arith.addf %212, %201 : vector<8x128xf32>
    %214 = arith.sitofp %198 : i32 to f32
    %215 = vector.broadcast %214 : f32 to vector<8x1xf32>
    %216 = arith.cmpf ogt, %3, %215 : vector<8x1xf32>
    %217 = vector.shape_cast %216 : vector<8x1xi1> to vector<8x1xi1>
    %218 = vector.broadcast %217 : vector<8x1xi1> to vector<8x128xi1>
    %219 = arith.select %218, %213, %196 : vector<8x128xi1>, vector<8x128xf32>
    %c0_i32_56 = arith.constant 0 : i32
    %220 = arith.cmpi eq, %198, %c0_i32_56 : i32
    %221 = vector.broadcast %5 : vector<1x128xf32> to vector<8x128xf32>
    %222 = arith.addf %221, %201 : vector<8x128xf32>
    %223 = arith.select %220, %222, %219 : vector<8x128xf32>
    %c8_i32_57 = arith.constant 8 : i32
    %c0_58 = arith.constant 0 : index
    %c0_59 = arith.constant 0 : index
    %224 = vector.load %arg9[%c0_58, %c0_59] : memref<8x128xf32, #tpu.memory_space<vmem>>, vector<8x128xf32>
    tpu.vector_store %arg9[%c0_58, %c0_59], %223 {strides = array<i32>} : memref<8x128xf32, #tpu.memory_space<vmem>>, vector<8x128xf32>,
    %c0_i32_60 = arith.constant 0 : i32
    %225 = arith.cmpi eq, %arg1, %c0_i32_60 : i32
    %226 = arith.extui %225 : i1 to i32
    %c0_i32_61 = arith.constant 0 : i32
    %227 = arith.cmpi ne, %226, %c0_i32_61 : i32
    scf.if %227 {
      %c0_62 = arith.constant 0 : index
      %c0_63 = arith.constant 0 : index
      %228 = vector.load %arg6[%c0_62, %c0_63] : memref<1x128xf32, #tpu.memory_space<vmem>>, vector<1x128xf32>
      %229 = vector.broadcast %228 : vector<1x128xf32> to vector<8x128xf32>
      %230 = arith.addf %223, %229 : vector<8x128xf32>
      %cst_64 = arith.constant dense<0xFF800000> : vector<8xf32>
      %231 = vector.multi_reduction <maximumf>, %230, %cst_64 [1] : vector<8x128xf32> to vector<8xf32>
      %232 = vector.shape_cast %231 : vector<8xf32> to vector<8x1xf32>
      %233 = vector.broadcast %232 : vector<8x1xf32> to vector<8x128xf32>
      %234 = arith.subf %230, %233 : vector<8x128xf32>
      %235 = math.exp %234 : vector<8x128xf32>
      %cst_65 = arith.constant dense<0.000000e+00> : vector<8xf32>
      %236 = vector.multi_reduction <add>, %235, %cst_65 [1] : vector<8x128xf32> to vector<8xf32>
      %237 = vector.shape_cast %236 : vector<8xf32> to vector<8x1xf32>
      %238 = math.log %237 : vector<8x1xf32>
      %239 = arith.addf %232, %238 : vector<8x1xf32>
      %c0_66 = arith.constant 0 : index
      %c0_67 = arith.constant 0 : index
      %240 = vector.load %arg8[%c0_66, %c0_67] : memref<8x1xf32, #tpu.memory_space<vmem>>, vector<8x1xf32>
      tpu.vector_store %arg8[%c0_66, %c0_67], %239 {strides = array<i32>} : memref<8x1xf32, #tpu.memory_space<vmem>>, vector<8x1xf32>,
    } else {
    }
    return
  }
  func.func @transform_0(%arg0: i32, %arg1: i32) -> (i32, i32, i32) {
    %c0_i32 = arith.constant 0 : i32
    %c0_i32_0 = arith.constant 0 : i32
    return %arg1, %arg0, %c0_i32 : i32, i32, i32
  }
  func.func @transform_1(%arg0: i32, %arg1: i32) -> (i32, i32) {
    %c0_i32 = arith.constant 0 : i32
    %c0_i32_0 = arith.constant 0 : i32
    return %arg0, %c0_i32 : i32, i32
  }
  func.func @transform_2(%arg0: i32, %arg1: i32) -> (i32, i32) {
    %c0_i32 = arith.constant 0 : i32
    %c0_i32_0 = arith.constant 0 : i32
    %c0_i32_1 = arith.constant 0 : i32
    return %c0_i32, %c0_i32_0 : i32, i32
  }
  func.func @transform_3(%arg0: i32, %arg1: i32) -> (i32, i32) {
    %c0_i32 = arith.constant 0 : i32
    %c0_i32_0 = arith.constant 0 : i32
    %c0_i32_1 = arith.constant 0 : i32
    return %c0_i32, %c0_i32_0 : i32, i32
  }
  func.func @transform_4(%arg0: i32, %arg1: i32) -> (i32, i32) {
    %c0_i32 = arith.constant 0 : i32
    %c0_i32_0 = arith.constant 0 : i32
    %c0_i32_1 = arith.constant 0 : i32
    return %c0_i32, %c0_i32_0 : i32, i32
  }
  func.func @transform_5(%arg0: i32, %arg1: i32) -> (i32, i32) {
    %c0_i32 = arith.constant 0 : i32
    %c0_i32_0 = arith.constant 0 : i32
    %c0_i32_1 = arith.constant 0 : i32
    return %c0_i32, %c0_i32_0 : i32, i32
  }
  func.func @transform_6(%arg0: i32, %arg1: i32) -> (i32, i32) {
    %c0_i32 = arith.constant 0 : i32
    %c0_i32_0 = arith.constant 0 : i32
    return %arg0, %c0_i32 : i32, i32
  }
}

</mosaic_0001>

<bundles_post_ra>
// kernel: tpu_custom_call.1
= control target key start
LH: loop header
LB: loop body
LE: loop exit
PB: predicated region body
PF: predicated region fallthrough
CT: control target
= control target key end

     0   :  { %s10745_s0 = inlined_call_operand.hbm [shape: f32[8,8,128], index: 0, kind: input, shape index: {}]   ;;  %s10746_s1 = inlined_call_operand.vmem [shape: f32[8,1], index: 1, kind: input, shape index: {}]   ;;  %s10747_s2 = inlined_call_operand.hbm [shape: f32[128,128], index: 2, kind: input, shape index: {}]   ;;  %s10748_s3 = inlined_call_operand.vmem [shape: f32[1,128], index: 3, kind: input, shape index: {}]   ;;  %s10749_s4 = inlined_call_operand.vmem [shape: f32[1,128], index: 4, kind: input, shape index: {}]   ;;  %s10750_s5 = inlined_call_operand.<no memory space> [shape: f32[1,1], index: 5, kind: input, shape index: {}]   ;;  %s10751_s6 = inlined_call_operand.vmem [shape: f32[8,1], index: 6, kind: output, shape index: {}]  }
   0x1   :  { %v11_v0 = vstv %s10750_s5 }
   0x2   :  { %12 = vst [vmem:[#allocation3] sm:$0x1] %v11_v0 }
   0x3   :  { %13 = vsyncpa [#allocation5], 0 }
   0x4   :  { %14 = vsyncpa [#allocation7], 0  ;;  %s9326_s23 = smov [#allocation4]   ;;  %s9278_s27 = scalar_lea.hbm %s10745_s0, 1024 }
   0x5   :  { %s20_s24 = sshll.u32 %s9326_s23, 4  ;;  %p9279_p0 = scmp.ne.s32.totalorder %s10745_s0, %s9278_s27  ;;  %s21_s24 = int_to_ptr.vmem [resolvable:$true] %s20_s24 }
   0x6   :  { %p9282_p1 = scmp.lt.u32.totalorder %s9278_s27, %s10745_s0 }
   0x8   :  { %p9284_p2 = pnand %p9282_p1, %p9279_p0 }
   0xa   :  { %9287 = shalt.err (!%p9284_p2)
}
   0xb   :  { %s9288_s5 = scalar_lea.vmem %s21_s24, 1024  ;;  %p9293_p4 = scmp.lt.s32.totalorder %s21_s24, %s21_s24 }
   0xc   :  { %p9289_p3 = scmp.ne.s32.totalorder %s21_s24, %s9288_s5  ;;  %p9294_p5 = scmp.lt.s32.totalorder %s9288_s5, %s9288_s5 }
   0xe   :  { %p9295_p6 = por %p9294_p5, %p9293_p4 }
  0x10   :  { %p9296_p7 = pnand %p9295_p6, %p9289_p3 }
  0x12   :  { %9299 = shalt.err (!%p9296_p7)
}
  0x13   :  { %s9327_s8 = smov 128   ;;  %s9328_s9 = smov 8  }
  0x14   :  { %26 = dma.hbm_to_vmem [thread:$0]  %s10745_s0, 1024, %s21_s24, [#allocation5], %s9327_s8, %s9327_s8, %s9328_s9  }
  0x15   :  { %s9329_s12 = smov [#allocation6]   ;;  %s9300_s16 = scalar_lea.hbm %s10747_s2, 2048 }
  0x16   :  { %s34_s13 = sshll.u32 %s9329_s12, 4  ;;  %p9301_p8 = scmp.ne.s32.totalorder %s10747_s2, %s9300_s16  ;;  %s35_s13 = int_to_ptr.vmem [resolvable:$true] %s34_s13 }
  0x17   :  { %p9304_p9 = scmp.lt.u32.totalorder %s9300_s16, %s10747_s2 }
  0x19   :  { %p9306_p10 = pnand %p9304_p9, %p9301_p8 }
  0x1b   :  { %9309 = shalt.err (!%p9306_p10)
}
  0x1c   :  { %s9310_s21 = scalar_lea.vmem %s35_s13, 2048  ;;  %p9315_p12 = scmp.lt.s32.totalorder %s35_s13, %s35_s13 }
  0x1d   :  { %p9311_p11 = scmp.ne.s32.totalorder %s35_s13, %s9310_s21  ;;  %p9316_p13 = scmp.lt.s32.totalorder %s9310_s21, %s9310_s21 }
  0x1f   :  { %p9317_p0 = por %p9316_p13, %p9315_p12 }
  0x21   :  { %p9318_p1 = pnand %p9317_p0, %p9311_p11 }
  0x23   :  { %9321 = shalt.err (!%p9318_p1)
}
  0x24   :  { %40 = dma.hbm_to_vmem [thread:$0]  %s10747_s2, 2048, %s35_s13, [#allocation7], %s9327_s8, %s9327_s8, %s9328_s9  }
  0x25   :  { %9322 = dma.done.wait [#allocation5], 1024  }
  0x26   :  { %9323 = vsyncadd [#allocation5], 4294966272 }
  0x27   :  { %9324 = dma.done.wait [#allocation7], 2048  }
  0x28   :  { %9325 = vsyncadd [#allocation7], 4294965248  ;;  %v9330_v1 = vmov 0.0|0.0   ;;  %v5512_v2 = vld [vmem:[%s10748_s3] ss:$0 sm:$0xff]  ;;  %v79_v3 = vld [vmem:[#allocation4] sm:$0xff] }
  0x29   :  { %8154 = vmatprep.subr.bf16.mxu0 %v9330_v1  ;;  %8010 = vmatprep.subr.bf16.mxu1 %v9330_v1  ;;  %v9401_v4 = vld [vmem:[#allocation6] sm:$0xff]  ;;  %v9403_v5 = vadd.f32 %v5512_v2, %v79_v3  ;;  %v9405_v6 = vld [vmem:[#allocation6 + $0x8] sm:$0xff]  ;;  %v9408_v8 = vld [vmem:[#allocation6 + $0x10] sm:$0xff]  ;;  %v9331_v22 = vmov 0   ;;  %vm9332_vm0 = vmmov 0   ;;  %v9333_v46 = vmov 0.0  }
  0x2a   :  { %v86_v7 = vand.u32 4294901760, %v9401_v4  ;;  %v9410_v9 = vld [vmem:[#allocation6 + $0x18] sm:$0xff]  ;;  %v89_v10 = vand.u32 4294901760, %v9405_v6  ;;  %v92_v11 = vand.u32 4294901760, %v9408_v8  ;;  %v9434_v15 = vld [vmem:[#allocation6 + $0x20] sm:$0xff]  ;;  %v9436_v16 = vld [vmem:[#allocation6 + $0x28] sm:$0xff]  ;;  %9240 = vset.pattern.permute.xlu1 %v9331_v22  ;;  %9241 = vset.pattern.permute.xlu0 %v9331_v22 }
  0x2b   :  { %v95_v12 = vand.u32 4294901760, %v9410_v9  ;;  %766 = vmax.xlane.f32.xlu0 %v9403_v5  ;;  %v98_v17 = vand.u32 4294901760, %v9434_v15  ;;  %v101_v18 = vand.u32 4294901760, %v9436_v16  ;;  %v9446_v20 = vld [vmem:[#allocation6 + $0x30] sm:$0xff]  ;;  %v9448_v21 = vld [vmem:[#allocation6 + $0x38] sm:$0xff]  ;;  %v9464_v26 = vld [vmem:[#allocation6 + $0x40] sm:$0xff]  ;;  %6572 = vmatprep.mubr.msk.f32.mxu0 %vm9332_vm0, %v9333_v46 }
  0x2c   :  { %v9418_v13 = vpack.c.bf16 %v89_v10, %v86_v7  ;;  %v104_v23 = vand.u32 4294901760, %v9446_v20  ;;  %v107_v24 = vand.u32 4294901760, %v9448_v21  ;;  %v9466_v27 = vld [vmem:[#allocation6 + $0x48] sm:$0xff]  ;;  %v110_v28 = vand.u32 4294901760, %v9464_v26  ;;  %v9480_v31 = vld [vmem:[#allocation6 + $0x50] sm:$0xff]  ;;  %v9482_v32 = vld [vmem:[#allocation6 + $0x58] sm:$0xff]  ;;  %6362 = vmatprep.mubr.msk.f32.mxu1 %vm9332_vm0, %v9333_v46 }
  0x2d   :  { %v9425_v14 = vpack.c.bf16 %v95_v12, %v92_v11  ;;  %v9444_v19 = vpack.c.bf16 %v101_v18, %v98_v17  ;;  %v113_v29 = vand.u32 4294901760, %v9466_v27  ;;  %v116_v33 = vand.u32 4294901760, %v9480_v31  ;;  %v9496_v36 = vld [vmem:[#allocation6 + $0x60] sm:$0xff]  ;;  %v9498_v37 = vld [vmem:[#allocation6 + $0x68] sm:$0xff]  ;;  %v9511_v41 = vld [vmem:[#allocation6 + $0x70] sm:$0xff] }
  0x2e   :  { %8156 = vmatpush3.bf16.msra.mxu0 %v9418_v13  ;;  %8012 = vmatpush3.bf16.msra.mxu1 %v9418_v13  ;;  %v9460_v25 = vpack.c.bf16 %v107_v24, %v104_v23  ;;  %v119_v34 = vand.u32 4294901760, %v9482_v32  ;;  %v122_v38 = vand.u32 4294901760, %v9496_v36  ;;  %v125_v39 = vand.u32 4294901760, %v9498_v37  ;;  %v9513_v42 = vld [vmem:[#allocation6 + $0x78] sm:$0xff] }
  0x2f   :  { %8157 = vmatprep.subr.bf16.mxu0 %v9330_v1  ;;  %8013 = vmatprep.subr.bf16.mxu1 %v9330_v1  ;;  %v9477_v30 = vpack.c.bf16 %v113_v29, %v110_v28  ;;  %v9516_v43 = vsub.f32 %v9401_v4, %v86_v7  ;;  %v128_v44 = vand.u32 4294901760, %v9511_v41  ;;  %v131_v45 = vand.u32 4294901760, %v9513_v42 }
  0x30   :  { %v9493_v35 = vpack.c.bf16 %v119_v34, %v116_v33  ;;  %v9509_v40 = vpack.c.bf16 %v125_v39, %v122_v38  ;;  %v9526_v47 = vsub.f32 %v9405_v6, %v89_v10  ;;  %80 = vmax.xlane.f32.xlu0 %v9333_v46  ;;  %v9552_v53 = vsub.f32 %v9408_v8, %v92_v11 }
  0x31   :  { %v179_v48 = vand.u32 4294901760, %v9516_v43  ;;  %v9538_v49 = vpack.c.bf16 %v131_v45, %v128_v44  ;;  %v9557_v54 = vsub.f32 %v9410_v9, %v95_v12  ;;  %v9576_v62 = vsub.f32 %v9434_v15, %v98_v17 }
  0x32   :  { %8159 = vmatpush3.bf16.msra.mxu0 %v9425_v14  ;;  %8015 = vmatpush3.bf16.msra.mxu1 %v9425_v14  ;;  %v186_v50 = vand.u32 4294901760, %v9526_v47  ;;  %v193_v57 = vand.u32 4294901760, %v9552_v53  ;;  %v9581_v63 = vsub.f32 %v9436_v16, %v101_v18  ;;  %v9593_v8 = vsub.f32 %v9446_v20, %v104_v23 }
  0x33   :  { %8160 = vmatprep.subr.bf16.mxu0 %v9330_v1  ;;  %8016 = vmatprep.subr.bf16.mxu1 %v9330_v1  ;;  %v180_v51 = vsub.f32 %v9516_v43, %v179_v48  ;;  %v200_v58 = vand.u32 4294901760, %v9557_v54  ;;  %v207_v3 = vand.u32 4294901760, %v9576_v62  ;;  %v9598_v9 = vsub.f32 %v9448_v21, %v107_v24 }
  0x34   :  { %v187_v52 = vsub.f32 %v9526_v47, %v186_v50  ;;  %v194_v60 = vsub.f32 %v9552_v53, %v193_v57  ;;  %v214_v4 = vand.u32 4294901760, %v9581_v63  ;;  %v221_v12 = vand.u32 4294901760, %v9593_v8 }
  0x35   :  { %v181_v55 = vand.u32 4294901760, %v180_v51  ;;  %v201_v61 = vsub.f32 %v9557_v54, %v200_v58  ;;  %v208_v7 = vsub.f32 %v9576_v62, %v207_v3  ;;  %v228_v15 = vand.u32 4294901760, %v9598_v9 }
  0x36   :  { %8162 = vmatpush3.bf16.msra.mxu0 %v9444_v19  ;;  %8018 = vmatpush3.bf16.msra.mxu1 %v9444_v19  ;;  %v188_v56 = vand.u32 4294901760, %v187_v52  ;;  %v195_v0 = vand.u32 4294901760, %v194_v60  ;;  %v215_v10 = vsub.f32 %v9581_v63, %v214_v4  ;;  %v222_v17 = vsub.f32 %v9593_v8, %v221_v12 }
  0x37   :  { %8163 = vmatprep.subr.bf16.mxu0 %v9330_v1  ;;  %8019 = vmatprep.subr.bf16.mxu1 %v9330_v1  ;;  %v202_v2 = vand.u32 4294901760, %v201_v61  ;;  %v209_v11 = vand.u32 4294901760, %v208_v7  ;;  %v229_v18 = vsub.f32 %v9598_v9, %v228_v15  ;;  %v9614_v20 = vsub.f32 %v9464_v26, %v110_v28 }
  0x38   :  { %v9565_v59 = vpack.c.bf16 %v188_v56, %v181_v55  ;;  %v216_v16 = vand.u32 4294901760, %v215_v10  ;;  %v9619_v21 = vsub.f32 %v9466_v27, %v113_v29  ;;  %v223_v24 = vand.u32 4294901760, %v222_v17 }
  0x39   :  { %v9585_v6 = vpack.c.bf16 %v202_v2, %v195_v0  ;;  %v230_v51 = vand.u32 4294901760, %v229_v18  ;;  %v235_v52 = vand.u32 4294901760, %v9614_v20  ;;  %v9636_v27 = vsub.f32 %v9480_v31, %v116_v33 }
  0x3a   :  { %8165 = vmatpush3.bf16.msra.mxu0 %v9460_v25  ;;  %8021 = vmatpush3.bf16.msra.mxu1 %v9460_v25  ;;  %v9621_v23 = vpack.c.bf16 %v216_v16, %v209_v11  ;;  %v10758_v55 = vand.u32 4294901760, %v9619_v21  ;;  %v9641_v29 = vsub.f32 %v9482_v32, %v119_v34  ;;  %v9653_v31 = vsub.f32 %v9496_v36, %v122_v38 }
  0x3b   :  { %8166 = vmatprep.subr.bf16.mxu0 %v9330_v1  ;;  %8022 = vmatprep.subr.bf16.mxu1 %v9330_v1  ;;  %v9625_v56 = vpack.c.bf16 %v230_v51, %v223_v24  ;;  %v236_v26 = vsub.f32 %v9614_v20, %v235_v52  ;;  %v10757_v0 = vand.u32 4294901760, %v9636_v27  ;;  %v9658_v32 = vsub.f32 %v9498_v37, %v125_v39 }
  0x3c   :  { %v243_v28 = vsub.f32 %v9619_v21, %v10758_v55  ;;  %v10756_v2 = vand.u32 4294901760, %v9641_v29  ;;  %v10755_v11 = vand.u32 4294901760, %v9653_v31  ;;  %v9674_v37 = vsub.f32 %v9511_v41, %v128_v44 }
  0x3d   :  { %v237_v60 = vand.u32 4294901760, %v236_v26  ;;  %v250_v10 = vsub.f32 %v9636_v27, %v10757_v0  ;;  %v10754_v16 = vand.u32 4294901760, %v9658_v32  ;;  %v9679_v39 = vsub.f32 %v9513_v42, %v131_v45 }
  0x3e   :  { %8168 = vmatpush3.bf16.msra.mxu0 %v9477_v30  ;;  %8024 = vmatpush3.bf16.msra.mxu1 %v9477_v30  ;;  %v244_v61 = vand.u32 4294901760, %v243_v28  ;;  %v257_v33 = vsub.f32 %v9641_v29, %v10756_v2  ;;  %v264_v36 = vsub.f32 %v9653_v31, %v10755_v11  ;;  %v10753_v26 = vand.u32 4294901760, %v9674_v37 }
  0x3f   :  { %8169 = vmatprep.subr.bf16.mxu0 %v9330_v1  ;;  %8025 = vmatprep.subr.bf16.mxu1 %v9330_v1  ;;  %v251_v34 = vand.u32 4294901760, %v250_v10  ;;  %v271_v38 = vsub.f32 %v9658_v32, %v10754_v16  ;;  %v10752_v28 = vand.u32 4294901760, %v9679_v39  ;;  %v9697_v10 = vpack.c.bf16 %v9526_v47, %v9516_v43 }
  0x40   :  { %v9645_v7 = vpack.c.bf16 %v244_v61, %v237_v60  ;;  %v258_v17 = vand.u32 4294901760, %v257_v33  ;;  %v265_v24 = vand.u32 4294901760, %v264_v36  ;;  %v278_v41 = vsub.f32 %v9674_v37, %v10753_v26 }
  0x41   :  { %v272_v51 = vand.u32 4294901760, %v271_v38  ;;  %v285_v44 = vsub.f32 %v9679_v39, %v10752_v28  ;;  %v9701_v33 = vpack.c.bf16 %v9557_v54, %v9552_v53  ;;  %v9713_v36 = vpack.c.bf16 %v9619_v21, %v9614_v20 }
  0x42   :  { %8171 = vmatpush3.bf16.msra.mxu0 %v9493_v35  ;;  %8027 = vmatpush3.bf16.msra.mxu1 %v9493_v35  ;;  %v9681_v18 = vpack.c.bf16 %v258_v17, %v251_v34  ;;  %v279_v42 = vand.u32 4294901760, %v278_v41  ;;  %v9705_v34 = vpack.c.bf16 %v9581_v63, %v9576_v62  ;;  %v9709_v17 = vpack.c.bf16 %v9598_v9, %v9593_v8  ;;  %v9727_v41 = vld [vmem:[#allocation3] ss:$0 sm:$0xff] }
  0x43   :  { %8172 = vmatprep.subr.bf16.mxu0 %v9330_v1  ;;  %8028 = vmatprep.subr.bf16.mxu1 %v9330_v1  ;;  %v9685_v60 = vpack.c.bf16 %v272_v51, %v265_v24  ;;  %v286_v45 = vand.u32 4294901760, %v285_v44  ;;  %v9717_v38 = vpack.c.bf16 %v9641_v29, %v9636_v27  ;;  %v9721_v24 = vpack.c.bf16 %v9658_v32, %v9653_v31 }
  0x44   :  { %v9725_v51 = vpack.c.bf16 %v9679_v39, %v9674_v37  ;;  %v9850_v43 = vpack.c.bf16 %v200_v58, %v193_v57  ;;  %v9862_v47 = vpack.c.bf16 %v214_v4, %v207_v3  ;;  %v10760_v54 = vand.u32 4294901760, %v9636_v27 }
  0x45   :  { %v9693_v61 = vpack.c.bf16 %v286_v45, %v279_v42  ;;  %v10761_v57 = vand.u32 4294901760, %v9641_v29  ;;  %v10762_v62 = vand.u32 4294901760, %v9653_v31  ;;  %v10763_v63 = vand.u32 4294901760, %v9658_v32 }
  0x46   :  { %8174 = vmatpush3.bf16.msra.mxu0 %v9509_v40  ;;  %8030 = vmatpush3.bf16.msra.mxu1 %v9509_v40  ;;  %v10764_v4 = vand.u32 4294901760, %v9674_v37  ;;  %v10765_v8 = vand.u32 4294901760, %v9679_v39  ;;  %v765_v39 = vld [vmem:[#allocation4 + $0x8] sm:$0xff]  ;;  %vm5503_vm15 = vcmask 7168  }
  0x47   :  { %8175 = vmatprep.subr.bf16.mxu0 %v9330_v1  ;;  %8031 = vmatprep.subr.bf16.mxu1 %v9330_v1  ;;  %v9892_v58 = vpack.c.bf16 %v10761_v57, %v10760_v54  ;;  %v9902_v3 = vpack.c.bf16 %v10763_v63, %v10762_v62 }
  0x48   :  { %v9912_v9 = vpack.c.bf16 %v10765_v8, %v10764_v4 }
  0x4a   :  { %8177 = vmatpush3.bf16.msra.mxu0 %v9538_v49  ;;  %8033 = vmatpush3.bf16.msra.mxu1 %v9538_v49 }
  0x4b   :  { %8178 = vmatprep.subr.bf16.mxu0 %v9330_v1  ;;  %8034 = vmatprep.subr.bf16.mxu1 %v9330_v1 }
  0xb8   :  { %v767_v44 = vpop.xlane.xlu0 %766 }
  0xb9   :  { %v768_v42 = vsub.f32 %v9403_v5, %v767_v44  ;;  %v1412_v45 = vadd.f32 %v9727_v41, %v767_v44 }
  0xbb   :  { %v769_v28 = vmul.f32 1.442695, %v768_v42  ;;  %1417 = vperm.xlu1 %9240, %v1412_v45  }
  0xbd   :  { %9242 = vpow2.f32 %v769_v28 }
  0xc7   :  { %v9243_v26 = vpop.eup %9242 }
  0xc8   :  { %v9731_v16 = vand.u32 4294901760, %v9243_v26 }
  0xca   :  { %v9734_v11 = vsub.f32 %v9243_v26, %v9731_v16 }
  0xcc   :  { %v854_v2 = vand.u32 4294901760, %v9734_v11 }
  0xce   :  { %v855_v0 = vsub.f32 %v9734_v11, %v854_v2 }
  0xd0   :  { %v856_v55 = vand.u32 4294901760, %v855_v0  ;;  %v9762_v0 = vld [vmem:[%s10746_s1] sm:$0xff] }
  0xd1   :  { %vm1424_vm1 = vcmp.gt.f32.partialorder %v9762_v0, 1.0  ;;  %vm2098_vm3 = vcmp.gt.f32.partialorder %v9762_v0, 2.0  ;;  %vm2772_vm4 = vcmp.gt.f32.partialorder %v9762_v0, 3.0 }
  0xd2   :  { %6573 = vmatmul.mubr.f32.vlgmr.msra.gmra.mrb[0].mxu0 %v856_v55  ;;  %v81_v55 = vpop.xlane.xlu0 %80  ;;  %v1425_v28 = vsel %vm1424_vm1, 1, %v9331_v22 }
  0xd3   :  { %8180 = vmatpush3.bf16.msra.mxu0 %v9565_v59  ;;  %6607 = vmatprep.mubr.msk.f32.mxu0 %vm9332_vm0, %v9333_v46  ;;  %v82_v26 = vsub.f32 0.0, %v81_v55 }
  0xd4   :  { %8181 = vmatprep.subr.bf16.mxu0 %v9330_v1  ;;  %1427 = vperm.xlu1 %9240, %v1425_v28  }
  0xd5   :  { %v83_v44 = vmul.f32 1.442695, %v82_v26 }
  0xd7   :  { %8183 = vmatpush3.bf16.msra.mxu0 %v9585_v6  ;;  %9244 = vpow2.f32 %v83_v44 }
  0xd8   :  { %8184 = vmatprep.subr.bf16.mxu0 %v9330_v1 }
  0xdb   :  { %8186 = vmatpush3.bf16.msra.mxu0 %v9621_v23 }
  0xdc   :  { %8187 = vmatprep.subr.bf16.mxu0 %v9330_v1 }
  0xdf   :  { %8189 = vmatpush3.bf16.msra.mxu0 %v9625_v56 }
  0xe0   :  { %8190 = vmatprep.subr.bf16.mxu0 %v9330_v1 }
  0xe1   :  { %v9245_v42 = vpop.eup %9244 }
  0xe2   :  { %v9776_v45 = vand.u32 4294901760, %v9245_v42 }
  0xe3   :  { %8192 = vmatpush3.bf16.msra.mxu0 %v9645_v7 }
  0xe4   :  { %8193 = vmatprep.subr.bf16.mxu0 %v9330_v1  ;;  %v9781_v55 = vsub.f32 %v9245_v42, %v9776_v45  ;;  %v9838_v42 = vpack.c.bf16 %v186_v50, %v179_v48  ;;  %v9872_v48 = vpack.c.bf16 %v228_v15, %v221_v12  ;;  %v10759_v50 = vand.u32 4294901760, %v9619_v21 }
  0xe6   :  { %v168_v26 = vand.u32 4294901760, %v9781_v55  ;;  %v9882_v53 = vpack.c.bf16 %v10759_v50, %v235_v52 }
  0xe7   :  { %8195 = vmatpush3.bf16.msra.mxu0 %v9681_v18 }
  0xe8   :  { %8196 = vmatprep.subr.bf16.mxu0 %v9330_v1  ;;  %v169_v28 = vsub.f32 %v9781_v55, %v168_v26 }
  0xea   :  { %v170_v44 = vand.u32 4294901760, %v169_v28 }
  0xeb   :  { %8198 = vmatpush3.bf16.msra.mxu0 %v9685_v60 }
  0xec   :  { %8199 = vmatprep.subr.bf16.mxu0 %v9330_v1  ;;  %6363 = vmatmul.mubr.f32.vlgmr.msra.gmra.mrb[0].mxu1 %v170_v44 }
  0xed   :  { %8036 = vmatpush3.bf16.msra.mxu1 %v9565_v59  ;;  %6397 = vmatprep.mubr.msk.f32.mxu1 %vm9332_vm0, %v9333_v46 }
  0xee   :  { %8037 = vmatprep.subr.bf16.mxu1 %v9330_v1 }
  0xef   :  { %8201 = vmatpush3.bf16.msra.mxu0 %v9693_v61 }
  0xf0   :  { %8202 = vmatprep.subr.bf16.mxu0 %v9330_v1 }
  0xf1   :  { %8039 = vmatpush3.bf16.msra.mxu1 %v9585_v6 }
  0xf2   :  { %6608 = vmatmul.mubr.f32.vlgmr.msra.gmra.mrb[0].mxu0 %v9731_v16  ;;  %8040 = vmatprep.subr.bf16.mxu1 %v9330_v1 }
  0xf3   :  { %8204 = vmatpush3.bf16.msra.mxu0 %v9697_v10  ;;  %6642 = vmatprep.mubr.msk.f32.mxu0 %vm9332_vm0, %v9333_v46 }
  0xf4   :  { %8205 = vmatprep.subr.bf16.mxu0 %v9330_v1 }
  0xf5   :  { %8042 = vmatpush3.bf16.msra.mxu1 %v9621_v23 }
  0xf6   :  { %8043 = vmatprep.subr.bf16.mxu1 %v9330_v1 }
  0xf7   :  { %8207 = vmatpush3.bf16.msra.mxu0 %v9701_v33 }
  0xf8   :  { %8208 = vmatprep.subr.bf16.mxu0 %v9330_v1 }
  0xf9   :  { %8045 = vmatpush3.bf16.msra.mxu1 %v9625_v56 }
  0xfa   :  { %8046 = vmatprep.subr.bf16.mxu1 %v9330_v1 }
  0xfb   :  { %8210 = vmatpush3.bf16.msra.mxu0 %v9705_v34 }
  0xfc   :  { %8211 = vmatprep.subr.bf16.mxu0 %v9330_v1 }
  0xfd   :  { %8048 = vmatpush3.bf16.msra.mxu1 %v9645_v7 }
  0xfe   :  { %8049 = vmatprep.subr.bf16.mxu1 %v9330_v1 }
  0xff   :  { %8213 = vmatpush3.bf16.msra.mxu0 %v9709_v17 }
 0x100   :  { %8214 = vmatprep.subr.bf16.mxu0 %v9330_v1 }
 0x101   :  { %8051 = vmatpush3.bf16.msra.mxu1 %v9681_v18 }
 0x102   :  { %8052 = vmatprep.subr.bf16.mxu1 %v9330_v1 }
 0x103   :  { %8216 = vmatpush3.bf16.msra.mxu0 %v9713_v36 }
 0x104   :  { %8217 = vmatprep.subr.bf16.mxu0 %v9330_v1 }
 0x105   :  { %8054 = vmatpush3.bf16.msra.mxu1 %v9685_v60 }
 0x106   :  { %8055 = vmatprep.subr.bf16.mxu1 %v9330_v1 }
 0x107   :  { %8219 = vmatpush3.bf16.msra.mxu0 %v9717_v38 }
 0x108   :  { %8220 = vmatprep.subr.bf16.mxu0 %v9330_v1 }
 0x109   :  { %8057 = vmatpush3.bf16.msra.mxu1 %v9693_v61 }
 0x10a   :  { %8058 = vmatprep.subr.bf16.mxu1 %v9330_v1 }
 0x10b   :  { %8222 = vmatpush3.bf16.msra.mxu0 %v9721_v24 }
 0x10c   :  { %8223 = vmatprep.subr.bf16.mxu0 %v9330_v1  ;;  %6398 = vmatmul.mubr.f32.vlgmr.msra.gmra.mrb[2].mxu1 %v9776_v45 }
 0x10d   :  { %8060 = vmatpush3.bf16.msra.mxu1 %v9697_v10  ;;  %6432 = vmatprep.mubr.msk.f32.mxu1 %vm9332_vm0, %v9333_v46 }
 0x10e   :  { %8061 = vmatprep.subr.bf16.mxu1 %v9330_v1 }
 0x10f   :  { %8225 = vmatpush3.bf16.msra.mxu0 %v9725_v51 }
 0x110   :  { %8226 = vmatprep.subr.bf16.mxu0 %v9330_v1 }
 0x111   :  { %8063 = vmatpush3.bf16.msra.mxu1 %v9701_v33 }
 0x112   :  { %6643 = vmatmul.mubr.f32.vlgmr.msra.gmra.mrb[0].mxu0 %v9734_v11  ;;  %8064 = vmatprep.subr.bf16.mxu1 %v9330_v1 }
 0x113   :  { %8228 = vmatpush3.bf16.msra.mxu0 %v9418_v13  ;;  %6677 = vmatprep.mubr.msk.f32.mxu0 %vm9332_vm0, %v9333_v46 }
 0x114   :  { %8229 = vmatprep.subr.bf16.mxu0 %v9330_v1 }
 0x115   :  { %8066 = vmatpush3.bf16.msra.mxu1 %v9705_v34 }
 0x116   :  { %8067 = vmatprep.subr.bf16.mxu1 %v9330_v1 }
 0x117   :  { %8231 = vmatpush3.bf16.msra.mxu0 %v9425_v14 }
 0x118   :  { %8232 = vmatprep.subr.bf16.mxu0 %v9330_v1 }
 0x119   :  { %8069 = vmatpush3.bf16.msra.mxu1 %v9709_v17 }
 0x11a   :  { %8070 = vmatprep.subr.bf16.mxu1 %v9330_v1 }
 0x11b   :  { %8234 = vmatpush3.bf16.msra.mxu0 %v9444_v19 }
 0x11c   :  { %8235 = vmatprep.subr.bf16.mxu0 %v9330_v1 }
 0x11d   :  { %8072 = vmatpush3.bf16.msra.mxu1 %v9713_v36 }
 0x11e   :  { %8073 = vmatprep.subr.bf16.mxu1 %v9330_v1 }
 0x11f   :  { %8237 = vmatpush3.bf16.msra.mxu0 %v9460_v25 }
 0x120   :  { %8238 = vmatprep.subr.bf16.mxu0 %v9330_v1 }
 0x121   :  { %8075 = vmatpush3.bf16.msra.mxu1 %v9717_v38 }
 0x122   :  { %8076 = vmatprep.subr.bf16.mxu1 %v9330_v1 }
 0x123   :  { %8240 = vmatpush3.bf16.msra.mxu0 %v9477_v30 }
 0x124   :  { %8241 = vmatprep.subr.bf16.mxu0 %v9330_v1 }
 0x125   :  { %8078 = vmatpush3.bf16.msra.mxu1 %v9721_v24 }
 0x126   :  { %8079 = vmatprep.subr.bf16.mxu1 %v9330_v1 }
 0x127   :  { %8243 = vmatpush3.bf16.msra.mxu0 %v9493_v35 }
 0x128   :  { %8244 = vmatprep.subr.bf16.mxu0 %v9330_v1 }
 0x129   :  { %8081 = vmatpush3.bf16.msra.mxu1 %v9725_v51 }
 0x12a   :  { %8082 = vmatprep.subr.bf16.mxu1 %v9330_v1 }
 0x12b   :  { %8246 = vmatpush3.bf16.msra.mxu0 %v9509_v40 }
 0x12c   :  { %8247 = vmatprep.subr.bf16.mxu0 %v9330_v1  ;;  %6433 = vmatmul.mubr.f32.vlgmr.msra.gmra.mrb[4].mxu1 %v9781_v55 }
 0x12d   :  { %8084 = vmatpush3.bf16.msra.mxu1 %v9418_v13  ;;  %6467 = vmatprep.mubr.msk.f32.mxu1 %vm9332_vm0, %v9333_v46 }
 0x12e   :  { %8085 = vmatprep.subr.bf16.mxu1 %v9330_v1 }
 0x12f   :  { %8249 = vmatpush3.bf16.msra.mxu0 %v9538_v49 }
 0x130   :  { %8250 = vmatprep.subr.bf16.mxu0 %v9330_v1 }
 0x131   :  { %8087 = vmatpush3.bf16.msra.mxu1 %v9425_v14 }
 0x132   :  { %6678 = vmatmul.mubr.f32.vlgmr.msra.gmra.mrb[0].mxu0 %v854_v2  ;;  %8088 = vmatprep.subr.bf16.mxu1 %v9330_v1 }
 0x133   :  { %8252 = vmatpush3.bf16.msra.mxu0 %v9838_v42  ;;  %6712 = vmatprep.mubr.msk.f32.mxu0 %vm9332_vm0, %v9333_v46 }
 0x134   :  { %8253 = vmatprep.subr.bf16.mxu0 %v9330_v1 }
 0x135   :  { %8090 = vmatpush3.bf16.msra.mxu1 %v9444_v19 }
 0x136   :  { %8091 = vmatprep.subr.bf16.mxu1 %v9330_v1 }
 0x137   :  { %8255 = vmatpush3.bf16.msra.mxu0 %v9850_v43 }
 0x138   :  { %8256 = vmatprep.subr.bf16.mxu0 %v9330_v1 }
 0x139   :  { %8093 = vmatpush3.bf16.msra.mxu1 %v9460_v25 }
 0x13a   :  { %8094 = vmatprep.subr.bf16.mxu1 %v9330_v1  ;;  %v1418_v11 = vpop.permute.xlu1 %1417 }
 0x13b   :  { %8258 = vmatpush3.bf16.msra.mxu0 %v9862_v47 }
 0x13c   :  { %8259 = vmatprep.subr.bf16.mxu0 %v9330_v1 }
 0x13d   :  { %8096 = vmatpush3.bf16.msra.mxu1 %v9477_v30 }
 0x13e   :  { %8097 = vmatprep.subr.bf16.mxu1 %v9330_v1 }
 0x13f   :  { %8261 = vmatpush3.bf16.msra.mxu0 %v9872_v48 }
 0x140   :  { %8262 = vmatprep.subr.bf16.mxu0 %v9330_v1 }
 0x141   :  { %8099 = vmatpush3.bf16.msra.mxu1 %v9493_v35 }
 0x142   :  { %8100 = vmatprep.subr.bf16.mxu1 %v9330_v1 }
 0x143   :  { %8264 = vmatpush3.bf16.msra.mxu0 %v9882_v53 }
 0x144   :  { %8265 = vmatprep.subr.bf16.mxu0 %v9330_v1 }
 0x145   :  { %8102 = vmatpush3.bf16.msra.mxu1 %v9509_v40 }
 0x146   :  { %8103 = vmatprep.subr.bf16.mxu1 %v9330_v1 }
 0x147   :  { %8267 = vmatpush3.bf16.msra.mxu0 %v9892_v58 }
 0x148   :  { %8268 = vmatprep.subr.bf16.mxu0 %v9330_v1 }
 0x149   :  { %8105 = vmatpush3.bf16.msra.mxu1 %v9538_v49 }
 0x14a   :  { %8106 = vmatprep.subr.bf16.mxu1 %v9330_v1 }
 0x14b   :  { %8270 = vmatpush3.bf16.msra.mxu0 %v9902_v3 }
 0x14c   :  { %8271 = vmatprep.subr.bf16.mxu0 %v9330_v1  ;;  %6468 = vmatmul.mubr.f32.vlgmr.msra.gmra.mrb[6].mxu1 %v168_v26 }
 0x14d   :  { %8108 = vmatpush3.bf16.msra.mxu1 %v9838_v42  ;;  %6502 = vmatprep.mubr.msk.f32.mxu1 %vm9332_vm0, %v9333_v46 }
 0x14e   :  { %8109 = vmatprep.subr.bf16.mxu1 %v9330_v1 }
 0x14f   :  { %8273 = vmatpush3.bf16.msra.mxu0 %v9912_v9 }
 0x150   :  { %8274 = vmatprep.subr.bf16.mxu0 %v9330_v1 }
 0x151   :  { %8111 = vmatpush3.bf16.msra.mxu1 %v9850_v43 }
 0x152   :  { %6713 = vmatmul.mubr.f32.vlgmr.msra.gmra.mrb[0].mxu0 %v9731_v16  ;;  %8112 = vmatprep.subr.bf16.mxu1 %v9330_v1 }
 0x153   :  { %8276 = vmatpush3.bf16.msra.mxu0 %v9418_v13  ;;  %6747 = vmatprep.mubr.msk.f32.mxu0 %vm9332_vm0, %v9333_v46  ;;  %v1428_v55 = vpop.permute.xlu1 %1427 }
 0x154   :  { %8277 = vmatprep.subr.bf16.mxu0 %v9330_v1  ;;  %vm1429_vm2 = vcmp.eq.s32.totalorder %v1428_v55, 1 }
 0x155   :  { %8114 = vmatpush3.bf16.msra.mxu1 %v9862_v47 }
 0x156   :  { %8115 = vmatprep.subr.bf16.mxu1 %v9330_v1 }
 0x157   :  { %8279 = vmatpush3.bf16.msra.mxu0 %v9425_v14 }
 0x158   :  { %8280 = vmatprep.subr.bf16.mxu0 %v9330_v1 }
 0x159   :  { %8117 = vmatpush3.bf16.msra.mxu1 %v9872_v48 }
 0x15a   :  { %8118 = vmatprep.subr.bf16.mxu1 %v9330_v1 }
 0x15b   :  { %8282 = vmatpush3.bf16.msra.mxu0 %v9444_v19 }
 0x15c   :  { %8283 = vmatprep.subr.bf16.mxu0 %v9330_v1 }
 0x15d   :  { %8120 = vmatpush3.bf16.msra.mxu1 %v9882_v53 }
 0x15e   :  { %8121 = vmatprep.subr.bf16.mxu1 %v9330_v1 }
 0x15f   :  { %8285 = vmatpush3.bf16.msra.mxu0 %v9460_v25 }
 0x160   :  { %8286 = vmatprep.subr.bf16.mxu0 %v9330_v1 }
 0x161   :  { %8123 = vmatpush3.bf16.msra.mxu1 %v9892_v58 }
 0x162   :  { %8124 = vmatprep.subr.bf16.mxu1 %v9330_v1 }
 0x163   :  { %8288 = vmatpush3.bf16.msra.mxu0 %v9477_v30 }
 0x164   :  { %8289 = vmatprep.subr.bf16.mxu0 %v9330_v1 }
 0x165   :  { %8126 = vmatpush3.bf16.msra.mxu1 %v9902_v3 }
 0x166   :  { %8127 = vmatprep.subr.bf16.mxu1 %v9330_v1 }
 0x167   :  { %8291 = vmatpush3.bf16.msra.mxu0 %v9493_v35 }
 0x168   :  { %8292 = vmatprep.subr.bf16.mxu0 %v9330_v1 }
 0x169   :  { %8129 = vmatpush3.bf16.msra.mxu1 %v9912_v9 }
 0x16a   :  { %8130 = vmatprep.subr.bf16.mxu1 %v9330_v1 }
 0x16b   :  { %8294 = vmatpush3.bf16.msra.mxu0 %v9509_v40 }
 0x16c   :  { %8295 = vmatprep.subr.bf16.mxu0 %v9330_v1  ;;  %6503 = vmatmul.mubr.f32.vlgmr.msra.gmra.mrb[8].mxu1 %v9776_v45 }
 0x16d   :  { %8132 = vmatpush3.bf16.msra.mxu1 %v9418_v13  ;;  %6537 = vmatprep.mubr.msk.f32.mxu1 %vm9332_vm0, %v9333_v46 }
 0x16e   :  { %8133 = vmatprep.subr.bf16.mxu1 %v9330_v1 }
 0x16f   :  { %8297 = vmatpush3.bf16.msra.mxu0 %v9538_v49 }
 0x170   :  { %8442 = vmatprep.subr.bf16.mxu0 %v9330_v1 }
 0x171   :  { %8135 = vmatpush3.bf16.msra.mxu1 %v9425_v14 }
 0x172   :  { %6748 = vmatmul.mubr.f32.vlgmr.msra.gmra.mrb[0].mxu0 %v9731_v16  ;;  %8136 = vmatprep.subr.bf16.mxu1 %v9330_v1 }
 0x173   :  { %8444 = vmatpush3.bf16.msra.mxu0 %v9418_v13  ;;  %6992 = vmatprep.mubr.msk.f32.mxu0 %vm9332_vm0, %v9333_v46 }
 0x174   :  { %8445 = vmatprep.subr.bf16.mxu0 %v9330_v1 }
 0x175   :  { %8138 = vmatpush3.bf16.msra.mxu1 %v9444_v19 }
 0x176   :  { %8139 = vmatprep.subr.bf16.mxu1 %v9330_v1 }
 0x177   :  { %8447 = vmatpush3.bf16.msra.mxu0 %v9425_v14 }
 0x178   :  { %8448 = vmatprep.subr.bf16.mxu0 %v9330_v1 }
 0x179   :  { %8141 = vmatpush3.bf16.msra.mxu1 %v9460_v25 }
 0x17a   :  { %8142 = vmatprep.subr.bf16.mxu1 %v9330_v1 }
 0x17b   :  { %8450 = vmatpush3.bf16.msra.mxu0 %v9444_v19 }
 0x17c   :  { %8451 = vmatprep.subr.bf16.mxu0 %v9330_v1 }
 0x17d   :  { %8144 = vmatpush3.bf16.msra.mxu1 %v9477_v30 }
 0x17e   :  { %8145 = vmatprep.subr.bf16.mxu1 %v9330_v1 }
 0x17f   :  { %8453 = vmatpush3.bf16.msra.mxu0 %v9460_v25 }
 0x180   :  { %8454 = vmatprep.subr.bf16.mxu0 %v9330_v1 }
 0x181   :  { %8147 = vmatpush3.bf16.msra.mxu1 %v9493_v35 }
 0x182   :  { %8148 = vmatprep.subr.bf16.mxu1 %v9330_v1 }
 0x183   :  { %8456 = vmatpush3.bf16.msra.mxu0 %v9477_v30 }
 0x184   :  { %8457 = vmatprep.subr.bf16.mxu0 %v9330_v1 }
 0x185   :  { %8150 = vmatpush3.bf16.msra.mxu1 %v9509_v40 }
 0x186   :  { %8151 = vmatprep.subr.bf16.mxu1 %v9330_v1 }
 0x187   :  { %8459 = vmatpush3.bf16.msra.mxu0 %v9493_v35 }
 0x188   :  { %8460 = vmatprep.subr.bf16.mxu0 %v9330_v1 }
 0x189   :  { %8153 = vmatpush3.bf16.msra.mxu1 %v9538_v49 }
 0x18a   :  { %8298 = vmatprep.subr.bf16.mxu1 %v9330_v1 }
 0x18b   :  { %8462 = vmatpush3.bf16.msra.mxu0 %v9509_v40 }
 0x18c   :  { %8463 = vmatprep.subr.bf16.mxu0 %v9330_v1  ;;  %6538 = vmatmul.mubr.f32.vlgmr.msra.gmra.mrb[10].mxu1 %v9776_v45 }
 0x18d   :  { %8300 = vmatpush3.bf16.msra.mxu1 %v9418_v13  ;;  %6782 = vmatprep.mubr.msk.f32.mxu1 %vm9332_vm0, %v9333_v46 }
 0x18e   :  { %8301 = vmatprep.subr.bf16.mxu1 %v9330_v1 }
 0x18f   :  { %8465 = vmatpush3.bf16.msra.mxu0 %v9538_v49 }
 0x190   :  { %8466 = vmatprep.subr.bf16.mxu0 %v9330_v1 }
 0x191   :  { %8303 = vmatpush3.bf16.msra.mxu1 %v9425_v14 }
 0x192   :  { %8304 = vmatprep.subr.bf16.mxu1 %v9330_v1 }
 0x195   :  { %8306 = vmatpush3.bf16.msra.mxu1 %v9444_v19 }
 0x196   :  { %8307 = vmatprep.subr.bf16.mxu1 %v9330_v1 }
 0x199   :  { %8309 = vmatpush3.bf16.msra.mxu1 %v9460_v25 }
 0x19a   :  { %8310 = vmatprep.subr.bf16.mxu1 %v9330_v1 }
 0x19d   :  { %8312 = vmatpush3.bf16.msra.mxu1 %v9477_v30 }
 0x19e   :  { %8313 = vmatprep.subr.bf16.mxu1 %v9330_v1 }
 0x1a1   :  { %8315 = vmatpush3.bf16.msra.mxu1 %v9493_v35 }
 0x1a2   :  { %8316 = vmatprep.subr.bf16.mxu1 %v9330_v1 }
 0x1a5   :  { %8318 = vmatpush3.bf16.msra.mxu1 %v9509_v40 }
 0x1a6   :  { %8319 = vmatprep.subr.bf16.mxu1 %v9330_v1 }
 0x1a9   :  { %8321 = vmatpush3.bf16.msra.mxu1 %v9538_v49 }
 0x1aa   :  { %8322 = vmatprep.subr.bf16.mxu1 %v9330_v1 }
 0x1bf   :  { %v172_v12 = vpop.f32.mrb[0].mxu1 }
 0x1c0   :  { %v6364_v15 = vpop.f32.mrb[1].mxu1 }
 0x1df   :  { %v323_v20 = vpop.f32.mrb[2].mxu1 }
 0x1e0   :  { %v6399_v21 = vpop.f32.mrb[3].mxu1 }
 0x1ff   :  { %v427_v52 = vpop.f32.mrb[4].mxu1 }
 0x200   :  { %v6434_v27 = vpop.f32.mrb[5].mxu1 }
 0x201   :  { %v2099_v27 = vsel %vm2098_vm3, 1, %v9331_v22 }
 0x21f   :  { %v516_v29 = vpop.f32.mrb[6].mxu1 }
 0x220   :  { %v6469_v2 = vpop.f32.mrb[7].mxu1  ;;  %v2773_v29 = vsel %vm2772_vm4, 1, %v9331_v22 }
 0x23f   :  { %v635_v44 = vpop.f32.mrb[8].mxu1 }
 0x240   :  { %v6504_v50 = vpop.f32.mrb[9].mxu1 }
 0x245   :  { %v1408_v31 = vpop.f32.mrb[0].mxu0 }
 0x246   :  { %9246 = vlog2.f32 %v1408_v31  ;;  %v6749_v32 = vpop.f32.mrb[1].mxu0 }
 0x250   :  { %v9247_v16 = vpop.eup %9246 }
 0x251   :  { %v1414_v37 = vmul.f32 0.6931472, %v9247_v16  ;;  %v1439_v16 = vld [vmem:[#allocation4 + $0x10] sm:$0xff] }
 0x253   :  { %v1420_v45 = vadd.f32 %v1418_v11, %v1414_v37 }
 0x255   :  { %v1421_v26 = vadd.f32 %v1420_v45, %v765_v39 }
 0x257   :  { %v10033_v28 = vsel %vm1429_vm2, %v1421_v26, %v9403_v5 }
 0x258   :  { %1440 = vmax.xlane.f32.xlu0 %v10033_v28 }
 0x25f   :  { %v722_v54 = vpop.f32.mrb[10].mxu1 }
 0x260   :  { %v6539_v57 = vpop.f32.mrb[11].mxu1 }
 0x26e   :  { %2101 = vperm.xlu0 %9241, %v2099_v27  }
 0x272   :  { %2775 = vperm.xlu0 %9241, %v2773_v29  }
 0x2e5   :  { %v1441_v62 = vpop.xlane.xlu0 %1440 }
 0x2e6   :  { %v1442_v63 = vsub.f32 %v10033_v28, %v1441_v62  ;;  %v2086_v4 = vadd.f32 %v9727_v41, %v1441_v62 }
 0x2e8   :  { %v1443_v8 = vmul.f32 1.442695, %v1442_v63  ;;  %2091 = vperm.xlu1 %9240, %v2086_v4  }
 0x2ea   :  { %9248 = vpow2.f32 %v1443_v8 }
 0x2ed   :  { %v2102_v39 = vpop.permute.xlu0 %2101 }
 0x2ee   :  { %vm2103_vm5 = vcmp.eq.s32.totalorder %v2102_v39, 1 }
 0x2f4   :  { %v9249_v12 = vpop.eup %9248 }
 0x2f5   :  { %v10038_v15 = vand.u32 4294901760, %v9249_v12 }
 0x2f7   :  { %v10041_v5 = vsub.f32 %v9249_v12, %v10038_v15 }
 0x2f9   :  { %v1528_v20 = vand.u32 4294901760, %v10041_v5 }
 0x2fb   :  { %v1529_v21 = vsub.f32 %v10041_v5, %v1528_v20 }
 0x2fd   :  { %v1530_v52 = vand.u32 4294901760, %v1529_v21  ;;  %v2113_v21 = vld [vmem:[#allocation4 + $0x18] sm:$0xff] }
 0x2ff   :  { %6783 = vmatmul.mubr.f32.vlgmr.msra.gmra.mrb[12].mxu1 %v1530_v52  ;;  %v2776_v52 = vpop.permute.xlu0 %2775 }
 0x300   :  { %8324 = vmatpush3.bf16.msra.mxu1 %v9565_v59  ;;  %6817 = vmatprep.mubr.msk.f32.mxu1 %vm9332_vm0, %v9333_v46  ;;  %vm2777_vm6 = vcmp.eq.s32.totalorder %v2776_v52, 1 }
 0x301   :  { %8325 = vmatprep.subr.bf16.mxu1 %v9330_v1 }
 0x304   :  { %8327 = vmatpush3.bf16.msra.mxu1 %v9585_v6 }
 0x305   :  { %8328 = vmatprep.subr.bf16.mxu1 %v9330_v1 }
 0x308   :  { %8330 = vmatpush3.bf16.msra.mxu1 %v9621_v23 }
 0x309   :  { %8331 = vmatprep.subr.bf16.mxu1 %v9330_v1 }
 0x30c   :  { %8333 = vmatpush3.bf16.msra.mxu1 %v9625_v56 }
 0x30d   :  { %8334 = vmatprep.subr.bf16.mxu1 %v9330_v1 }
 0x310   :  { %8336 = vmatpush3.bf16.msra.mxu1 %v9645_v7 }
 0x311   :  { %8337 = vmatprep.subr.bf16.mxu1 %v9330_v1 }
 0x314   :  { %8339 = vmatpush3.bf16.msra.mxu1 %v9681_v18 }
 0x315   :  { %8340 = vmatprep.subr.bf16.mxu1 %v9330_v1 }
 0x318   :  { %8342 = vmatpush3.bf16.msra.mxu1 %v9685_v60 }
 0x319   :  { %8343 = vmatprep.subr.bf16.mxu1 %v9330_v1 }
 0x31c   :  { %8345 = vmatpush3.bf16.msra.mxu1 %v9693_v61 }
 0x31d   :  { %8346 = vmatprep.subr.bf16.mxu1 %v9330_v1 }
 0x31f   :  { %6818 = vmatmul.mubr.f32.vlgmr.msra.gmra.mrb[12].mxu1 %v10038_v15 }
 0x320   :  { %8348 = vmatpush3.bf16.msra.mxu1 %v9697_v10  ;;  %6852 = vmatprep.mubr.msk.f32.mxu1 %vm9332_vm0, %v9333_v46 }
 0x321   :  { %8349 = vmatprep.subr.bf16.mxu1 %v9330_v1 }
 0x324   :  { %8351 = vmatpush3.bf16.msra.mxu1 %v9701_v33 }
 0x325   :  { %8352 = vmatprep.subr.bf16.mxu1 %v9330_v1 }
 0x328   :  { %8354 = vmatpush3.bf16.msra.mxu1 %v9705_v34 }
 0x329   :  { %8355 = vmatprep.subr.bf16.mxu1 %v9330_v1 }
 0x32c   :  { %8357 = vmatpush3.bf16.msra.mxu1 %v9709_v17 }
 0x32d   :  { %8358 = vmatprep.subr.bf16.mxu1 %v9330_v1 }
 0x330   :  { %8360 = vmatpush3.bf16.msra.mxu1 %v9713_v36 }
 0x331   :  { %8361 = vmatprep.subr.bf16.mxu1 %v9330_v1 }
 0x334   :  { %8363 = vmatpush3.bf16.msra.mxu1 %v9717_v38 }
 0x335   :  { %8364 = vmatprep.subr.bf16.mxu1 %v9330_v1 }
 0x338   :  { %8366 = vmatpush3.bf16.msra.mxu1 %v9721_v24 }
 0x339   :  { %8367 = vmatprep.subr.bf16.mxu1 %v9330_v1 }
 0x33c   :  { %8369 = vmatpush3.bf16.msra.mxu1 %v9725_v51 }
 0x33d   :  { %8370 = vmatprep.subr.bf16.mxu1 %v9330_v1 }
 0x33f   :  { %6853 = vmatmul.mubr.f32.vlgmr.msra.gmra.mrb[12].mxu1 %v10041_v5 }
 0x340   :  { %8372 = vmatpush3.bf16.msra.mxu1 %v9418_v13  ;;  %6887 = vmatprep.mubr.msk.f32.mxu1 %vm9332_vm0, %v9333_v46 }
 0x341   :  { %8373 = vmatprep.subr.bf16.mxu1 %v9330_v1 }
 0x344   :  { %8375 = vmatpush3.bf16.msra.mxu1 %v9425_v14 }
 0x345   :  { %8376 = vmatprep.subr.bf16.mxu1 %v9330_v1 }
 0x348   :  { %8378 = vmatpush3.bf16.msra.mxu1 %v9444_v19 }
 0x349   :  { %8379 = vmatprep.subr.bf16.mxu1 %v9330_v1 }
 0x34c   :  { %8381 = vmatpush3.bf16.msra.mxu1 %v9460_v25 }
 0x34d   :  { %8382 = vmatprep.subr.bf16.mxu1 %v9330_v1 }
 0x350   :  { %8384 = vmatpush3.bf16.msra.mxu1 %v9477_v30 }
 0x351   :  { %8385 = vmatprep.subr.bf16.mxu1 %v9330_v1 }
 0x354   :  { %8387 = vmatpush3.bf16.msra.mxu1 %v9493_v35 }
 0x355   :  { %8388 = vmatprep.subr.bf16.mxu1 %v9330_v1 }
 0x358   :  { %8390 = vmatpush3.bf16.msra.mxu1 %v9509_v40 }
 0x359   :  { %8391 = vmatprep.subr.bf16.mxu1 %v9330_v1 }
 0x35c   :  { %8393 = vmatpush3.bf16.msra.mxu1 %v9538_v49 }
 0x35d   :  { %8394 = vmatprep.subr.bf16.mxu1 %v9330_v1 }
 0x35f   :  { %6888 = vmatmul.mubr.f32.vlgmr.msra.gmra.mrb[12].mxu1 %v1528_v20 }
 0x360   :  { %8396 = vmatpush3.bf16.msra.mxu1 %v9838_v42  ;;  %6922 = vmatprep.mubr.msk.f32.mxu1 %vm9332_vm0, %v9333_v46 }
 0x361   :  { %8397 = vmatprep.subr.bf16.mxu1 %v9330_v1 }
 0x364   :  { %8399 = vmatpush3.bf16.msra.mxu1 %v9850_v43 }
 0x365   :  { %8400 = vmatprep.subr.bf16.mxu1 %v9330_v1 }
 0x367   :  { %v2092_v11 = vpop.permute.xlu1 %2091 }
 0x368   :  { %8402 = vmatpush3.bf16.msra.mxu1 %v9862_v47 }
 0x369   :  { %8403 = vmatprep.subr.bf16.mxu1 %v9330_v1 }
 0x36c   :  { %8405 = vmatpush3.bf16.msra.mxu1 %v9872_v48 }
 0x36d   :  { %8406 = vmatprep.subr.bf16.mxu1 %v9330_v1 }
 0x370   :  { %8408 = vmatpush3.bf16.msra.mxu1 %v9882_v53 }
 0x371   :  { %8409 = vmatprep.subr.bf16.mxu1 %v9330_v1 }
 0x374   :  { %8411 = vmatpush3.bf16.msra.mxu1 %v9892_v58 }
 0x375   :  { %8412 = vmatprep.subr.bf16.mxu1 %v9330_v1 }
 0x378   :  { %8414 = vmatpush3.bf16.msra.mxu1 %v9902_v3 }
 0x379   :  { %8415 = vmatprep.subr.bf16.mxu1 %v9330_v1 }
 0x37c   :  { %8417 = vmatpush3.bf16.msra.mxu1 %v9912_v9 }
 0x37d   :  { %8418 = vmatprep.subr.bf16.mxu1 %v9330_v1 }
 0x37f   :  { %6923 = vmatmul.mubr.f32.vlgmr.msra.gmra.mrb[12].mxu1 %v10038_v15 }
 0x380   :  { %8420 = vmatpush3.bf16.msra.mxu1 %v9418_v13  ;;  %6957 = vmatprep.mubr.msk.f32.mxu1 %vm9332_vm0, %v9333_v46 }
 0x381   :  { %8421 = vmatprep.subr.bf16.mxu1 %v9330_v1 }
 0x384   :  { %8423 = vmatpush3.bf16.msra.mxu1 %v9425_v14 }
 0x385   :  { %8424 = vmatprep.subr.bf16.mxu1 %v9330_v1 }
 0x388   :  { %8426 = vmatpush3.bf16.msra.mxu1 %v9444_v19 }
 0x389   :  { %8427 = vmatprep.subr.bf16.mxu1 %v9330_v1 }
 0x38c   :  { %8429 = vmatpush3.bf16.msra.mxu1 %v9460_v25 }
 0x38d   :  { %8430 = vmatprep.subr.bf16.mxu1 %v9330_v1 }
 0x390   :  { %8432 = vmatpush3.bf16.msra.mxu1 %v9477_v30 }
 0x391   :  { %8433 = vmatprep.subr.bf16.mxu1 %v9330_v1 }
 0x394   :  { %8435 = vmatpush3.bf16.msra.mxu1 %v9493_v35 }
 0x395   :  { %8436 = vmatprep.subr.bf16.mxu1 %v9330_v1 }
 0x398   :  { %8438 = vmatpush3.bf16.msra.mxu1 %v9509_v40 }
 0x399   :  { %8439 = vmatprep.subr.bf16.mxu1 %v9330_v1 }
 0x39c   :  { %8441 = vmatpush3.bf16.msra.mxu1 %v9538_v49 }
 0x39d   :  { %8586 = vmatprep.subr.bf16.mxu1 %v9330_v1 }
 0x39f   :  { %6958 = vmatmul.mubr.f32.vlgmr.msra.gmra.mrb[12].mxu1 %v10038_v15 }
 0x3a0   :  { %8588 = vmatpush3.bf16.msra.mxu1 %v9418_v13  ;;  %7202 = vmatprep.mubr.msk.f32.mxu1 %vm9332_vm0, %v9333_v46 }
 0x3a1   :  { %8589 = vmatprep.subr.bf16.mxu1 %v9330_v1 }
 0x3a4   :  { %8591 = vmatpush3.bf16.msra.mxu1 %v9425_v14 }
 0x3a5   :  { %8592 = vmatprep.subr.bf16.mxu1 %v9330_v1 }
 0x3a8   :  { %8594 = vmatpush3.bf16.msra.mxu1 %v9444_v19 }
 0x3a9   :  { %8595 = vmatprep.subr.bf16.mxu1 %v9330_v1 }
 0x3ac   :  { %8597 = vmatpush3.bf16.msra.mxu1 %v9460_v25 }
 0x3ad   :  { %8598 = vmatprep.subr.bf16.mxu1 %v9330_v1 }
 0x3b0   :  { %8600 = vmatpush3.bf16.msra.mxu1 %v9477_v30 }
 0x3b1   :  { %8601 = vmatprep.subr.bf16.mxu1 %v9330_v1 }
 0x3b4   :  { %8603 = vmatpush3.bf16.msra.mxu1 %v9493_v35 }
 0x3b5   :  { %8604 = vmatprep.subr.bf16.mxu1 %v9330_v1 }
 0x3b8   :  { %8606 = vmatpush3.bf16.msra.mxu1 %v9509_v40 }
 0x3b9   :  { %8607 = vmatprep.subr.bf16.mxu1 %v9330_v1 }
 0x3bc   :  { %8609 = vmatpush3.bf16.msra.mxu1 %v9538_v49 }
 0x3bd   :  { %8610 = vmatprep.subr.bf16.mxu1 %v9330_v1 }
 0x472   :  { %v2082_v0 = vpop.f32.mrb[12].mxu1 }
 0x473   :  { %9250 = vlog2.f32 %v2082_v0  ;;  %v6959_v2 = vpop.f32.mrb[13].mxu1 }
 0x47d   :  { %v9251_v31 = vpop.eup %9250 }
 0x47e   :  { %v2088_v32 = vmul.f32 0.6931472, %v9251_v31 }
 0x480   :  { %v2094_v37 = vadd.f32 %v2092_v11, %v2088_v32  ;;  %v10286_v32 = vld [vmem:[#allocation3] ss:$0 sm:$0xff] }
 0x482   :  { %v2095_v45 = vadd.f32 %v2094_v37, %v1439_v16  ;;  %v10292_v16 = vld [vmem:[%s10746_s1] sm:$0xff] }
 0x483   :  { %vm3446_vm7 = vcmp.gt.f32.partialorder %v10292_v16, 4.0  ;;  %vm4120_vm9 = vcmp.gt.f32.partialorder %v10292_v16, 5.0  ;;  %vm4794_vm11 = vcmp.gt.f32.partialorder %v10292_v16, 6.0  ;;  %vm5468_vm13 = vcmp.gt.f32.partialorder %v10292_v16, 7.0 }
 0x484   :  { %v10162_v55 = vsel %vm2103_vm5, %v2095_v45, %v10033_v28  ;;  %v3447_v39 = vsel %vm3446_vm7, 1, %v9331_v22 }
 0x485   :  { %2114 = vmax.xlane.f32.xlu1 %v10162_v55 }
 0x512   :  { %v2115_v26 = vpop.xlane.xlu1 %2114 }
 0x513   :  { %v2116_v44 = vsub.f32 %v10162_v55, %v2115_v26  ;;  %v2760_v50 = vadd.f32 %v9727_v41, %v2115_v26 }
 0x515   :  { %v2117_v54 = vmul.f32 1.442695, %v2116_v44  ;;  %2765 = vperm.xlu1 %9240, %v2760_v50  }
 0x517   :  { %9252 = vpow2.f32 %v2117_v54 }
 0x521   :  { %v9253_v57 = vpop.eup %9252 }
 0x522   :  { %v10167_v62 = vand.u32 4294901760, %v9253_v57 }
 0x524   :  { %v2201_v63 = vsub.f32 %v9253_v57, %v10167_v62 }
 0x526   :  { %v2202_v4 = vand.u32 4294901760, %v2201_v63 }
 0x528   :  { %v2203_v8 = vsub.f32 %v2201_v63, %v2202_v4 }
 0x52a   :  { %v2204_v12 = vand.u32 4294901760, %v2203_v8 }
 0x52c   :  { %6993 = vmatmul.mubr.f32.vlgmr.msra.gmra.mrb[2].mxu0 %v2204_v12  ;;  %v2787_v12 = vld [vmem:[#allocation4 + $0x20] sm:$0xff] }
 0x52d   :  { %8468 = vmatpush3.bf16.msra.mxu0 %v9565_v59  ;;  %7027 = vmatprep.mubr.msk.f32.mxu0 %vm9332_vm0, %v9333_v46 }
 0x52e   :  { %8469 = vmatprep.subr.bf16.mxu0 %v9330_v1 }
 0x531   :  { %8471 = vmatpush3.bf16.msra.mxu0 %v9585_v6 }
 0x532   :  { %8472 = vmatprep.subr.bf16.mxu0 %v9330_v1 }
 0x535   :  { %8474 = vmatpush3.bf16.msra.mxu0 %v9621_v23 }
 0x536   :  { %8475 = vmatprep.subr.bf16.mxu0 %v9330_v1 }
 0x539   :  { %8477 = vmatpush3.bf16.msra.mxu0 %v9625_v56 }
 0x53a   :  { %8478 = vmatprep.subr.bf16.mxu0 %v9330_v1 }
 0x53d   :  { %8480 = vmatpush3.bf16.msra.mxu0 %v9645_v7 }
 0x53e   :  { %8481 = vmatprep.subr.bf16.mxu0 %v9330_v1 }
 0x541   :  { %8483 = vmatpush3.bf16.msra.mxu0 %v9681_v18 }
 0x542   :  { %8484 = vmatprep.subr.bf16.mxu0 %v9330_v1 }
 0x545   :  { %8486 = vmatpush3.bf16.msra.mxu0 %v9685_v60 }
 0x546   :  { %8487 = vmatprep.subr.bf16.mxu0 %v9330_v1 }
 0x549   :  { %8489 = vmatpush3.bf16.msra.mxu0 %v9693_v61 }
 0x54a   :  { %8490 = vmatprep.subr.bf16.mxu0 %v9330_v1 }
 0x54c   :  { %7028 = vmatmul.mubr.f32.vlgmr.msra.gmra.mrb[2].mxu0 %v10167_v62 }
 0x54d   :  { %8492 = vmatpush3.bf16.msra.mxu0 %v9697_v10  ;;  %7062 = vmatprep.mubr.msk.f32.mxu0 %vm9332_vm0, %v9333_v46 }
 0x54e   :  { %8493 = vmatprep.subr.bf16.mxu0 %v9330_v1 }
 0x551   :  { %8495 = vmatpush3.bf16.msra.mxu0 %v9701_v33 }
 0x552   :  { %8496 = vmatprep.subr.bf16.mxu0 %v9330_v1 }
 0x555   :  { %8498 = vmatpush3.bf16.msra.mxu0 %v9705_v34 }
 0x556   :  { %8499 = vmatprep.subr.bf16.mxu0 %v9330_v1 }
 0x559   :  { %8501 = vmatpush3.bf16.msra.mxu0 %v9709_v17 }
 0x55a   :  { %8502 = vmatprep.subr.bf16.mxu0 %v9330_v1 }
 0x55d   :  { %8504 = vmatpush3.bf16.msra.mxu0 %v9713_v36 }
 0x55e   :  { %8505 = vmatprep.subr.bf16.mxu0 %v9330_v1 }
 0x561   :  { %8507 = vmatpush3.bf16.msra.mxu0 %v9717_v38 }
 0x562   :  { %8508 = vmatprep.subr.bf16.mxu0 %v9330_v1 }
 0x565   :  { %8510 = vmatpush3.bf16.msra.mxu0 %v9721_v24 }
 0x566   :  { %8511 = vmatprep.subr.bf16.mxu0 %v9330_v1 }
 0x569   :  { %8513 = vmatpush3.bf16.msra.mxu0 %v9725_v51 }
 0x56a   :  { %8514 = vmatprep.subr.bf16.mxu0 %v9330_v1 }
 0x56c   :  { %7063 = vmatmul.mubr.f32.vlgmr.msra.gmra.mrb[2].mxu0 %v2201_v63 }
 0x56d   :  { %8516 = vmatpush3.bf16.msra.mxu0 %v9418_v13  ;;  %7097 = vmatprep.mubr.msk.f32.mxu0 %vm9332_vm0, %v9333_v46 }
 0x56e   :  { %8517 = vmatprep.subr.bf16.mxu0 %v9330_v1 }
 0x571   :  { %8519 = vmatpush3.bf16.msra.mxu0 %v9425_v14 }
 0x572   :  { %8520 = vmatprep.subr.bf16.mxu0 %v9330_v1 }
 0x575   :  { %8522 = vmatpush3.bf16.msra.mxu0 %v9444_v19 }
 0x576   :  { %8523 = vmatprep.subr.bf16.mxu0 %v9330_v1 }
 0x579   :  { %8525 = vmatpush3.bf16.msra.mxu0 %v9460_v25 }
 0x57a   :  { %8526 = vmatprep.subr.bf16.mxu0 %v9330_v1 }
 0x57d   :  { %8528 = vmatpush3.bf16.msra.mxu0 %v9477_v30 }
 0x57e   :  { %8529 = vmatprep.subr.bf16.mxu0 %v9330_v1 }
 0x581   :  { %8531 = vmatpush3.bf16.msra.mxu0 %v9493_v35 }
 0x582   :  { %8532 = vmatprep.subr.bf16.mxu0 %v9330_v1 }
 0x585   :  { %8534 = vmatpush3.bf16.msra.mxu0 %v9509_v40 }
 0x586   :  { %8535 = vmatprep.subr.bf16.mxu0 %v9330_v1 }
 0x589   :  { %8537 = vmatpush3.bf16.msra.mxu0 %v9538_v49 }
 0x58a   :  { %8538 = vmatprep.subr.bf16.mxu0 %v9330_v1 }
 0x58c   :  { %7098 = vmatmul.mubr.f32.vlgmr.msra.gmra.mrb[2].mxu0 %v2202_v4 }
 0x58d   :  { %8540 = vmatpush3.bf16.msra.mxu0 %v9838_v42  ;;  %7132 = vmatprep.mubr.msk.f32.mxu0 %vm9332_vm0, %v9333_v46 }
 0x58e   :  { %8541 = vmatprep.subr.bf16.mxu0 %v9330_v1 }
 0x591   :  { %8543 = vmatpush3.bf16.msra.mxu0 %v9850_v43 }
 0x592   :  { %8544 = vmatprep.subr.bf16.mxu0 %v9330_v1 }
 0x594   :  { %v2766_v20 = vpop.permute.xlu1 %2765 }
 0x595   :  { %8546 = vmatpush3.bf16.msra.mxu0 %v9862_v47 }
 0x596   :  { %8547 = vmatprep.subr.bf16.mxu0 %v9330_v1 }
 0x599   :  { %8549 = vmatpush3.bf16.msra.mxu0 %v9872_v48 }
 0x59a   :  { %8550 = vmatprep.subr.bf16.mxu0 %v9330_v1 }
 0x59d   :  { %8552 = vmatpush3.bf16.msra.mxu0 %v9882_v53 }
 0x59e   :  { %8553 = vmatprep.subr.bf16.mxu0 %v9330_v1 }
 0x5a1   :  { %8555 = vmatpush3.bf16.msra.mxu0 %v9892_v58 }
 0x5a2   :  { %8556 = vmatprep.subr.bf16.mxu0 %v9330_v1 }
 0x5a5   :  { %8558 = vmatpush3.bf16.msra.mxu0 %v9902_v3 }
 0x5a6   :  { %8559 = vmatprep.subr.bf16.mxu0 %v9330_v1 }
 0x5a9   :  { %8561 = vmatpush3.bf16.msra.mxu0 %v9912_v9 }
 0x5aa   :  { %8562 = vmatprep.subr.bf16.mxu0 %v9330_v1 }
 0x5ac   :  { %7133 = vmatmul.mubr.f32.vlgmr.msra.gmra.mrb[2].mxu0 %v10167_v62 }
 0x5ad   :  { %8564 = vmatpush3.bf16.msra.mxu0 %v9418_v13  ;;  %7167 = vmatprep.mubr.msk.f32.mxu0 %vm9332_vm0, %v9333_v46 }
 0x5ae   :  { %8565 = vmatprep.subr.bf16.mxu0 %v9330_v1 }
 0x5b1   :  { %8567 = vmatpush3.bf16.msra.mxu0 %v9425_v14 }
 0x5b2   :  { %8568 = vmatprep.subr.bf16.mxu0 %v9330_v1 }
 0x5b5   :  { %8570 = vmatpush3.bf16.msra.mxu0 %v9444_v19 }
 0x5b6   :  { %8571 = vmatprep.subr.bf16.mxu0 %v9330_v1 }
 0x5b9   :  { %8573 = vmatpush3.bf16.msra.mxu0 %v9460_v25 }
 0x5ba   :  { %8574 = vmatprep.subr.bf16.mxu0 %v9330_v1 }
 0x5bd   :  { %8576 = vmatpush3.bf16.msra.mxu0 %v9477_v30 }
 0x5be   :  { %8577 = vmatprep.subr.bf16.mxu0 %v9330_v1 }
 0x5c1   :  { %8579 = vmatpush3.bf16.msra.mxu0 %v9493_v35 }
 0x5c2   :  { %8580 = vmatprep.subr.bf16.mxu0 %v9330_v1 }
 0x5c5   :  { %8582 = vmatpush3.bf16.msra.mxu0 %v9509_v40 }
 0x5c6   :  { %8583 = vmatprep.subr.bf16.mxu0 %v9330_v1 }
 0x5c9   :  { %8585 = vmatpush3.bf16.msra.mxu0 %v9538_v49 }
 0x5ca   :  { %8730 = vmatprep.subr.bf16.mxu0 %v9330_v1 }
 0x5cc   :  { %7168 = vmatmul.mubr.f32.vlgmr.msra.gmra.mrb[2].mxu0 %v10167_v62 }
 0x5cd   :  { %8732 = vmatpush3.bf16.msra.mxu0 %v9418_v13  ;;  %7412 = vmatprep.mubr.msk.f32.mxu0 %vm9332_vm0, %v9333_v46 }
 0x5ce   :  { %8733 = vmatprep.subr.bf16.mxu0 %v9330_v1 }
 0x5d1   :  { %8735 = vmatpush3.bf16.msra.mxu0 %v9425_v14 }
 0x5d2   :  { %8736 = vmatprep.subr.bf16.mxu0 %v9330_v1 }
 0x5d5   :  { %8738 = vmatpush3.bf16.msra.mxu0 %v9444_v19 }
 0x5d6   :  { %8739 = vmatprep.subr.bf16.mxu0 %v9330_v1 }
 0x5d9   :  { %8741 = vmatpush3.bf16.msra.mxu0 %v9460_v25 }
 0x5da   :  { %8742 = vmatprep.subr.bf16.mxu0 %v9330_v1 }
 0x5dd   :  { %8744 = vmatpush3.bf16.msra.mxu0 %v9477_v30 }
 0x5de   :  { %8745 = vmatprep.subr.bf16.mxu0 %v9330_v1 }
 0x5e1   :  { %8747 = vmatpush3.bf16.msra.mxu0 %v9493_v35 }
 0x5e2   :  { %8748 = vmatprep.subr.bf16.mxu0 %v9330_v1 }
 0x5e5   :  { %8750 = vmatpush3.bf16.msra.mxu0 %v9509_v40 }
 0x5e6   :  { %8751 = vmatprep.subr.bf16.mxu0 %v9330_v1 }
 0x5e9   :  { %8753 = vmatpush3.bf16.msra.mxu0 %v9538_v49 }
 0x5ea   :  { %8754 = vmatprep.subr.bf16.mxu0 %v9330_v1 }
 0x69f   :  { %v2756_v41 = vpop.f32.mrb[2].mxu0 }
 0x6a0   :  { %9254 = vlog2.f32 %v2756_v41  ;;  %v7169_v28 = vpop.f32.mrb[3].mxu0 }
 0x6aa   :  { %v9255_v15 = vpop.eup %9254 }
 0x6ab   :  { %v2762_v5 = vmul.f32 0.6931472, %v9255_v15 }
 0x6ad   :  { %v2768_v27 = vadd.f32 %v2766_v20, %v2762_v5  ;;  %v4121_v20 = vsel %vm4120_vm9, 1, %v9331_v22 }
 0x6af   :  { %v2769_v29 = vadd.f32 %v2768_v27, %v2113_v21 }
 0x6b1   :  { %v10282_v0 = vsel %vm2777_vm6, %v2769_v29, %v10162_v55 }
 0x6b2   :  { %2788 = vmax.xlane.f32.xlu0 %v10282_v0 }
 0x73f   :  { %v2789_v2 = vpop.xlane.xlu0 %2788 }
 0x740   :  { %v2790_v31 = vsub.f32 %v10282_v0, %v2789_v2  ;;  %v3434_v11 = vadd.f32 %v10286_v32, %v2789_v2 }
 0x742   :  { %v2791_v37 = vmul.f32 1.442695, %v2790_v31  ;;  %3439 = vperm.xlu1 %9240, %v3434_v11  }
 0x744   :  { %9256 = vpow2.f32 %v2791_v37 }
 0x746   :  { %3449 = vperm.xlu1 %9240, %v3447_v39  }
 0x74e   :  { %v9257_v45 = vpop.eup %9256 }
 0x74f   :  { %v10296_v55 = vand.u32 4294901760, %v9257_v45 }
 0x751   :  { %v2875_v26 = vsub.f32 %v9257_v45, %v10296_v55 }
 0x753   :  { %v2876_v44 = vand.u32 4294901760, %v2875_v26 }
 0x755   :  { %v2877_v50 = vsub.f32 %v2875_v26, %v2876_v44 }
 0x757   :  { %v2878_v54 = vand.u32 4294901760, %v2877_v50 }
 0x759   :  { %7203 = vmatmul.mubr.f32.vlgmr.msra.gmra.mrb[14].mxu1 %v2878_v54  ;;  %v3461_v54 = vld [vmem:[#allocation4 + $0x28] sm:$0xff] }
 0x75a   :  { %8612 = vmatpush3.bf16.msra.mxu1 %v9565_v59  ;;  %7237 = vmatprep.mubr.msk.f32.mxu1 %vm9332_vm0, %v9333_v46 }
 0x75b   :  { %8613 = vmatprep.subr.bf16.mxu1 %v9330_v1 }
 0x75e   :  { %8615 = vmatpush3.bf16.msra.mxu1 %v9585_v6 }
 0x75f   :  { %8616 = vmatprep.subr.bf16.mxu1 %v9330_v1 }
 0x762   :  { %8618 = vmatpush3.bf16.msra.mxu1 %v9621_v23 }
 0x763   :  { %8619 = vmatprep.subr.bf16.mxu1 %v9330_v1 }
 0x766   :  { %8621 = vmatpush3.bf16.msra.mxu1 %v9625_v56 }
 0x767   :  { %8622 = vmatprep.subr.bf16.mxu1 %v9330_v1 }
 0x76a   :  { %8624 = vmatpush3.bf16.msra.mxu1 %v9645_v7 }
 0x76b   :  { %8625 = vmatprep.subr.bf16.mxu1 %v9330_v1 }
 0x76e   :  { %8627 = vmatpush3.bf16.msra.mxu1 %v9681_v18 }
 0x76f   :  { %8628 = vmatprep.subr.bf16.mxu1 %v9330_v1 }
 0x772   :  { %8630 = vmatpush3.bf16.msra.mxu1 %v9685_v60 }
 0x773   :  { %8631 = vmatprep.subr.bf16.mxu1 %v9330_v1 }
 0x776   :  { %8633 = vmatpush3.bf16.msra.mxu1 %v9693_v61 }
 0x777   :  { %8634 = vmatprep.subr.bf16.mxu1 %v9330_v1 }
 0x779   :  { %7238 = vmatmul.mubr.f32.vlgmr.msra.gmra.mrb[14].mxu1 %v10296_v55 }
 0x77a   :  { %8636 = vmatpush3.bf16.msra.mxu1 %v9697_v10  ;;  %7272 = vmatprep.mubr.msk.f32.mxu1 %vm9332_vm0, %v9333_v46 }
 0x77b   :  { %8637 = vmatprep.subr.bf16.mxu1 %v9330_v1 }
 0x77e   :  { %8639 = vmatpush3.bf16.msra.mxu1 %v9701_v33 }
 0x77f   :  { %8640 = vmatprep.subr.bf16.mxu1 %v9330_v1 }
 0x782   :  { %8642 = vmatpush3.bf16.msra.mxu1 %v9705_v34 }
 0x783   :  { %8643 = vmatprep.subr.bf16.mxu1 %v9330_v1 }
 0x786   :  { %8645 = vmatpush3.bf16.msra.mxu1 %v9709_v17 }
 0x787   :  { %8646 = vmatprep.subr.bf16.mxu1 %v9330_v1 }
 0x78a   :  { %8648 = vmatpush3.bf16.msra.mxu1 %v9713_v36 }
 0x78b   :  { %8649 = vmatprep.subr.bf16.mxu1 %v9330_v1 }
 0x78e   :  { %8651 = vmatpush3.bf16.msra.mxu1 %v9717_v38 }
 0x78f   :  { %8652 = vmatprep.subr.bf16.mxu1 %v9330_v1 }
 0x792   :  { %8654 = vmatpush3.bf16.msra.mxu1 %v9721_v24 }
 0x793   :  { %8655 = vmatprep.subr.bf16.mxu1 %v9330_v1 }
 0x796   :  { %8657 = vmatpush3.bf16.msra.mxu1 %v9725_v51 }
 0x797   :  { %8658 = vmatprep.subr.bf16.mxu1 %v9330_v1 }
 0x799   :  { %7273 = vmatmul.mubr.f32.vlgmr.msra.gmra.mrb[14].mxu1 %v2875_v26 }
 0x79a   :  { %8660 = vmatpush3.bf16.msra.mxu1 %v9418_v13  ;;  %7307 = vmatprep.mubr.msk.f32.mxu1 %vm9332_vm0, %v9333_v46 }
 0x79b   :  { %8661 = vmatprep.subr.bf16.mxu1 %v9330_v1 }
 0x79e   :  { %8663 = vmatpush3.bf16.msra.mxu1 %v9425_v14 }
 0x79f   :  { %8664 = vmatprep.subr.bf16.mxu1 %v9330_v1 }
 0x7a2   :  { %8666 = vmatpush3.bf16.msra.mxu1 %v9444_v19 }
 0x7a3   :  { %8667 = vmatprep.subr.bf16.mxu1 %v9330_v1 }
 0x7a6   :  { %8669 = vmatpush3.bf16.msra.mxu1 %v9460_v25 }
 0x7a7   :  { %8670 = vmatprep.subr.bf16.mxu1 %v9330_v1 }
 0x7aa   :  { %8672 = vmatpush3.bf16.msra.mxu1 %v9477_v30 }
 0x7ab   :  { %8673 = vmatprep.subr.bf16.mxu1 %v9330_v1 }
 0x7ae   :  { %8675 = vmatpush3.bf16.msra.mxu1 %v9493_v35 }
 0x7af   :  { %8676 = vmatprep.subr.bf16.mxu1 %v9330_v1 }
 0x7b2   :  { %8678 = vmatpush3.bf16.msra.mxu1 %v9509_v40 }
 0x7b3   :  { %8679 = vmatprep.subr.bf16.mxu1 %v9330_v1 }
 0x7b6   :  { %8681 = vmatpush3.bf16.msra.mxu1 %v9538_v49 }
 0x7b7   :  { %8682 = vmatprep.subr.bf16.mxu1 %v9330_v1 }
 0x7b9   :  { %7308 = vmatmul.mubr.f32.vlgmr.msra.gmra.mrb[14].mxu1 %v2876_v44 }
 0x7ba   :  { %8684 = vmatpush3.bf16.msra.mxu1 %v9838_v42  ;;  %7342 = vmatprep.mubr.msk.f32.mxu1 %vm9332_vm0, %v9333_v46 }
 0x7bb   :  { %8685 = vmatprep.subr.bf16.mxu1 %v9330_v1 }
 0x7be   :  { %8687 = vmatpush3.bf16.msra.mxu1 %v9850_v43 }
 0x7bf   :  { %8688 = vmatprep.subr.bf16.mxu1 %v9330_v1 }
 0x7c1   :  { %v3440_v63 = vpop.permute.xlu1 %3439 }
 0x7c2   :  { %8690 = vmatpush3.bf16.msra.mxu1 %v9862_v47 }
 0x7c3   :  { %8691 = vmatprep.subr.bf16.mxu1 %v9330_v1 }
 0x7c5   :  { %v3450_v41 = vpop.permute.xlu1 %3449 }
 0x7c6   :  { %8693 = vmatpush3.bf16.msra.mxu1 %v9872_v48  ;;  %vm3451_vm8 = vcmp.eq.s32.totalorder %v3450_v41, 1 }
 0x7c7   :  { %8694 = vmatprep.subr.bf16.mxu1 %v9330_v1 }
 0x7ca   :  { %8696 = vmatpush3.bf16.msra.mxu1 %v9882_v53 }
 0x7cb   :  { %8697 = vmatprep.subr.bf16.mxu1 %v9330_v1 }
 0x7ce   :  { %8699 = vmatpush3.bf16.msra.mxu1 %v9892_v58 }
 0x7cf   :  { %8700 = vmatprep.subr.bf16.mxu1 %v9330_v1 }
 0x7d2   :  { %8702 = vmatpush3.bf16.msra.mxu1 %v9902_v3 }
 0x7d3   :  { %8703 = vmatprep.subr.bf16.mxu1 %v9330_v1 }
 0x7d6   :  { %8705 = vmatpush3.bf16.msra.mxu1 %v9912_v9 }
 0x7d7   :  { %8706 = vmatprep.subr.bf16.mxu1 %v9330_v1 }
 0x7d9   :  { %7343 = vmatmul.mubr.f32.vlgmr.msra.gmra.mrb[14].mxu1 %v10296_v55 }
 0x7da   :  { %8708 = vmatpush3.bf16.msra.mxu1 %v9418_v13  ;;  %7377 = vmatprep.mubr.msk.f32.mxu1 %vm9332_vm0, %v9333_v46 }
 0x7db   :  { %8709 = vmatprep.subr.bf16.mxu1 %v9330_v1 }
 0x7de   :  { %8711 = vmatpush3.bf16.msra.mxu1 %v9425_v14 }
 0x7df   :  { %8712 = vmatprep.subr.bf16.mxu1 %v9330_v1 }
 0x7e2   :  { %8714 = vmatpush3.bf16.msra.mxu1 %v9444_v19 }
 0x7e3   :  { %8715 = vmatprep.subr.bf16.mxu1 %v9330_v1 }
 0x7e6   :  { %8717 = vmatpush3.bf16.msra.mxu1 %v9460_v25 }
 0x7e7   :  { %8718 = vmatprep.subr.bf16.mxu1 %v9330_v1 }
 0x7ea   :  { %8720 = vmatpush3.bf16.msra.mxu1 %v9477_v30 }
 0x7eb   :  { %8721 = vmatprep.subr.bf16.mxu1 %v9330_v1 }
 0x7ee   :  { %8723 = vmatpush3.bf16.msra.mxu1 %v9493_v35 }
 0x7ef   :  { %8724 = vmatprep.subr.bf16.mxu1 %v9330_v1 }
 0x7f2   :  { %8726 = vmatpush3.bf16.msra.mxu1 %v9509_v40 }
 0x7f3   :  { %8727 = vmatprep.subr.bf16.mxu1 %v9330_v1 }
 0x7f6   :  { %8729 = vmatpush3.bf16.msra.mxu1 %v9538_v49 }
 0x7f7   :  { %8874 = vmatprep.subr.bf16.mxu1 %v9330_v1 }
 0x7f9   :  { %7378 = vmatmul.mubr.f32.vlgmr.msra.gmra.mrb[14].mxu1 %v10296_v55 }
 0x7fa   :  { %8876 = vmatpush3.bf16.msra.mxu1 %v9418_v13  ;;  %7622 = vmatprep.mubr.msk.f32.mxu1 %vm9332_vm0, %v9333_v46 }
 0x7fb   :  { %8877 = vmatprep.subr.bf16.mxu1 %v9330_v1 }
 0x7fe   :  { %8879 = vmatpush3.bf16.msra.mxu1 %v9425_v14 }
 0x7ff   :  { %8880 = vmatprep.subr.bf16.mxu1 %v9330_v1 }
 0x802   :  { %8882 = vmatpush3.bf16.msra.mxu1 %v9444_v19 }
 0x803   :  { %8883 = vmatprep.subr.bf16.mxu1 %v9330_v1 }
 0x806   :  { %8885 = vmatpush3.bf16.msra.mxu1 %v9460_v25 }
 0x807   :  { %8886 = vmatprep.subr.bf16.mxu1 %v9330_v1 }
 0x80a   :  { %8888 = vmatpush3.bf16.msra.mxu1 %v9477_v30 }
 0x80b   :  { %8889 = vmatprep.subr.bf16.mxu1 %v9330_v1 }
 0x80e   :  { %8891 = vmatpush3.bf16.msra.mxu1 %v9493_v35 }
 0x80f   :  { %8892 = vmatprep.subr.bf16.mxu1 %v9330_v1 }
 0x812   :  { %8894 = vmatpush3.bf16.msra.mxu1 %v9509_v40 }
 0x813   :  { %8895 = vmatprep.subr.bf16.mxu1 %v9330_v1 }
 0x816   :  { %8897 = vmatpush3.bf16.msra.mxu1 %v9538_v49 }
 0x817   :  { %8898 = vmatprep.subr.bf16.mxu1 %v9330_v1 }
 0x8cc   :  { %v3430_v57 = vpop.f32.mrb[14].mxu1 }
 0x8cd   :  { %9258 = vlog2.f32 %v3430_v57  ;;  %v7379_v62 = vpop.f32.mrb[15].mxu1 }
 0x8d7   :  { %v9259_v4 = vpop.eup %9258 }
 0x8d8   :  { %v3436_v8 = vmul.f32 0.6931472, %v9259_v4 }
 0x8da   :  { %v3442_v28 = vadd.f32 %v3440_v63, %v3436_v8 }
 0x8dc   :  { %v3443_v15 = vadd.f32 %v3442_v28, %v2787_v12 }
 0x8de   :  { %v10411_v5 = vsel %vm3451_vm8, %v3443_v15, %v10282_v0  ;;  %v4795_v15 = vsel %vm4794_vm11, 1, %v9331_v22 }
 0x8df   :  { %3462 = vmax.xlane.f32.xlu1 %v10411_v5 }
 0x8f0   :  { %4123 = vperm.xlu1 %9240, %v4121_v20  }
 0x96c   :  { %v3463_v21 = vpop.xlane.xlu1 %3462 }
 0x96d   :  { %v3464_v52 = vsub.f32 %v10411_v5, %v3463_v21  ;;  %v4108_v27 = vadd.f32 %v10286_v32, %v3463_v21 }
 0x96f   :  { %v3465_v29 = vmul.f32 1.442695, %v3464_v52  ;;  %4113 = vperm.xlu0 %9241, %v4108_v27  }
 0x970   :  { %v4124_v57 = vpop.permute.xlu1 %4123 }
 0x971   :  { %9260 = vpow2.f32 %v3465_v29  ;;  %vm4125_vm10 = vcmp.eq.s32.totalorder %v4124_v57, 1 }
 0x97b   :  { %v9261_v2 = vpop.eup %9260 }
 0x97c   :  { %v10418_v31 = vand.u32 4294901760, %v9261_v2 }
 0x97e   :  { %v3549_v0 = vsub.f32 %v9261_v2, %v10418_v31 }
 0x980   :  { %v3550_v11 = vand.u32 4294901760, %v3549_v0 }
 0x982   :  { %v3551_v37 = vsub.f32 %v3549_v0, %v3550_v11 }
 0x984   :  { %v3552_v39 = vand.u32 4294901760, %v3551_v37 }
 0x986   :  { %7413 = vmatmul.mubr.f32.vlgmr.msra.gmra.mrb[4].mxu0 %v3552_v39  ;;  %v4135_v39 = vld [vmem:[#allocation4 + $0x30] sm:$0xff] }
 0x987   :  { %8756 = vmatpush3.bf16.msra.mxu0 %v9565_v59  ;;  %7447 = vmatprep.mubr.msk.f32.mxu0 %vm9332_vm0, %v9333_v46 }
 0x988   :  { %8757 = vmatprep.subr.bf16.mxu0 %v9330_v1 }
 0x98b   :  { %8759 = vmatpush3.bf16.msra.mxu0 %v9585_v6 }
 0x98c   :  { %8760 = vmatprep.subr.bf16.mxu0 %v9330_v1 }
 0x98f   :  { %8762 = vmatpush3.bf16.msra.mxu0 %v9621_v23 }
 0x990   :  { %8763 = vmatprep.subr.bf16.mxu0 %v9330_v1 }
 0x993   :  { %8765 = vmatpush3.bf16.msra.mxu0 %v9625_v56 }
 0x994   :  { %8766 = vmatprep.subr.bf16.mxu0 %v9330_v1 }
 0x997   :  { %8768 = vmatpush3.bf16.msra.mxu0 %v9645_v7 }
 0x998   :  { %8769 = vmatprep.subr.bf16.mxu0 %v9330_v1 }
 0x99b   :  { %8771 = vmatpush3.bf16.msra.mxu0 %v9681_v18 }
 0x99c   :  { %8772 = vmatprep.subr.bf16.mxu0 %v9330_v1 }
 0x99f   :  { %8774 = vmatpush3.bf16.msra.mxu0 %v9685_v60 }
 0x9a0   :  { %8775 = vmatprep.subr.bf16.mxu0 %v9330_v1 }
 0x9a3   :  { %8777 = vmatpush3.bf16.msra.mxu0 %v9693_v61 }
 0x9a4   :  { %8778 = vmatprep.subr.bf16.mxu0 %v9330_v1 }
 0x9a6   :  { %7448 = vmatmul.mubr.f32.vlgmr.msra.gmra.mrb[4].mxu0 %v10418_v31 }
 0x9a7   :  { %8780 = vmatpush3.bf16.msra.mxu0 %v9697_v10  ;;  %7482 = vmatprep.mubr.msk.f32.mxu0 %vm9332_vm0, %v9333_v46 }
 0x9a8   :  { %8781 = vmatprep.subr.bf16.mxu0 %v9330_v1 }
 0x9ab   :  { %8783 = vmatpush3.bf16.msra.mxu0 %v9701_v33 }
 0x9ac   :  { %8784 = vmatprep.subr.bf16.mxu0 %v9330_v1 }
 0x9af   :  { %8786 = vmatpush3.bf16.msra.mxu0 %v9705_v34 }
 0x9b0   :  { %8787 = vmatprep.subr.bf16.mxu0 %v9330_v1 }
 0x9b3   :  { %8789 = vmatpush3.bf16.msra.mxu0 %v9709_v17 }
 0x9b4   :  { %8790 = vmatprep.subr.bf16.mxu0 %v9330_v1 }
 0x9b7   :  { %8792 = vmatpush3.bf16.msra.mxu0 %v9713_v36 }
 0x9b8   :  { %8793 = vmatprep.subr.bf16.mxu0 %v9330_v1 }
 0x9bb   :  { %8795 = vmatpush3.bf16.msra.mxu0 %v9717_v38 }
 0x9bc   :  { %8796 = vmatprep.subr.bf16.mxu0 %v9330_v1 }
 0x9bf   :  { %8798 = vmatpush3.bf16.msra.mxu0 %v9721_v24 }
 0x9c0   :  { %8799 = vmatprep.subr.bf16.mxu0 %v9330_v1 }
 0x9c3   :  { %8801 = vmatpush3.bf16.msra.mxu0 %v9725_v51 }
 0x9c4   :  { %8802 = vmatprep.subr.bf16.mxu0 %v9330_v1 }
 0x9c6   :  { %7483 = vmatmul.mubr.f32.vlgmr.msra.gmra.mrb[4].mxu0 %v3549_v0 }
 0x9c7   :  { %8804 = vmatpush3.bf16.msra.mxu0 %v9418_v13  ;;  %7517 = vmatprep.mubr.msk.f32.mxu0 %vm9332_vm0, %v9333_v46 }
 0x9c8   :  { %8805 = vmatprep.subr.bf16.mxu0 %v9330_v1 }
 0x9cb   :  { %8807 = vmatpush3.bf16.msra.mxu0 %v9425_v14 }
 0x9cc   :  { %8808 = vmatprep.subr.bf16.mxu0 %v9330_v1 }
 0x9cf   :  { %8810 = vmatpush3.bf16.msra.mxu0 %v9444_v19 }
 0x9d0   :  { %8811 = vmatprep.subr.bf16.mxu0 %v9330_v1 }
 0x9d3   :  { %8813 = vmatpush3.bf16.msra.mxu0 %v9460_v25 }
 0x9d4   :  { %8814 = vmatprep.subr.bf16.mxu0 %v9330_v1 }
 0x9d7   :  { %8816 = vmatpush3.bf16.msra.mxu0 %v9477_v30 }
 0x9d8   :  { %8817 = vmatprep.subr.bf16.mxu0 %v9330_v1 }
 0x9db   :  { %8819 = vmatpush3.bf16.msra.mxu0 %v9493_v35 }
 0x9dc   :  { %8820 = vmatprep.subr.bf16.mxu0 %v9330_v1 }
 0x9df   :  { %8822 = vmatpush3.bf16.msra.mxu0 %v9509_v40 }
 0x9e0   :  { %8823 = vmatprep.subr.bf16.mxu0 %v9330_v1 }
 0x9e3   :  { %8825 = vmatpush3.bf16.msra.mxu0 %v9538_v49 }
 0x9e4   :  { %8826 = vmatprep.subr.bf16.mxu0 %v9330_v1 }
 0x9e6   :  { %7518 = vmatmul.mubr.f32.vlgmr.msra.gmra.mrb[4].mxu0 %v3550_v11 }
 0x9e7   :  { %8828 = vmatpush3.bf16.msra.mxu0 %v9838_v42  ;;  %7552 = vmatprep.mubr.msk.f32.mxu0 %vm9332_vm0, %v9333_v46 }
 0x9e8   :  { %8829 = vmatprep.subr.bf16.mxu0 %v9330_v1 }
 0x9eb   :  { %8831 = vmatpush3.bf16.msra.mxu0 %v9850_v43 }
 0x9ec   :  { %8832 = vmatprep.subr.bf16.mxu0 %v9330_v1 }
 0x9ee   :  { %v4114_v50 = vpop.permute.xlu0 %4113 }
 0x9ef   :  { %8834 = vmatpush3.bf16.msra.mxu0 %v9862_v47 }
 0x9f0   :  { %8835 = vmatprep.subr.bf16.mxu0 %v9330_v1 }
 0x9f3   :  { %8837 = vmatpush3.bf16.msra.mxu0 %v9872_v48 }
 0x9f4   :  { %8838 = vmatprep.subr.bf16.mxu0 %v9330_v1 }
 0x9f7   :  { %8840 = vmatpush3.bf16.msra.mxu0 %v9882_v53 }
 0x9f8   :  { %8841 = vmatprep.subr.bf16.mxu0 %v9330_v1 }
 0x9fb   :  { %8843 = vmatpush3.bf16.msra.mxu0 %v9892_v58 }
 0x9fc   :  { %8844 = vmatprep.subr.bf16.mxu0 %v9330_v1 }
 0x9ff   :  { %8846 = vmatpush3.bf16.msra.mxu0 %v9902_v3 }
 0xa00   :  { %8847 = vmatprep.subr.bf16.mxu0 %v9330_v1 }
 0xa03   :  { %8849 = vmatpush3.bf16.msra.mxu0 %v9912_v9 }
 0xa04   :  { %8850 = vmatprep.subr.bf16.mxu0 %v9330_v1 }
 0xa06   :  { %7553 = vmatmul.mubr.f32.vlgmr.msra.gmra.mrb[4].mxu0 %v10418_v31 }
 0xa07   :  { %8852 = vmatpush3.bf16.msra.mxu0 %v9418_v13  ;;  %7587 = vmatprep.mubr.msk.f32.mxu0 %vm9332_vm0, %v9333_v46 }
 0xa08   :  { %8853 = vmatprep.subr.bf16.mxu0 %v9330_v1 }
 0xa0b   :  { %8855 = vmatpush3.bf16.msra.mxu0 %v9425_v14 }
 0xa0c   :  { %8856 = vmatprep.subr.bf16.mxu0 %v9330_v1 }
 0xa0f   :  { %8858 = vmatpush3.bf16.msra.mxu0 %v9444_v19 }
 0xa10   :  { %8859 = vmatprep.subr.bf16.mxu0 %v9330_v1 }
 0xa13   :  { %8861 = vmatpush3.bf16.msra.mxu0 %v9460_v25 }
 0xa14   :  { %8862 = vmatprep.subr.bf16.mxu0 %v9330_v1 }
 0xa17   :  { %8864 = vmatpush3.bf16.msra.mxu0 %v9477_v30 }
 0xa18   :  { %8865 = vmatprep.subr.bf16.mxu0 %v9330_v1 }
 0xa1b   :  { %8867 = vmatpush3.bf16.msra.mxu0 %v9493_v35 }
 0xa1c   :  { %8868 = vmatprep.subr.bf16.mxu0 %v9330_v1 }
 0xa1f   :  { %8870 = vmatpush3.bf16.msra.mxu0 %v9509_v40 }
 0xa20   :  { %8871 = vmatprep.subr.bf16.mxu0 %v9330_v1 }
 0xa23   :  { %8873 = vmatpush3.bf16.msra.mxu0 %v9538_v49 }
 0xa24   :  { %9018 = vmatprep.subr.bf16.mxu0 %v9330_v1 }
 0xa26   :  { %7588 = vmatmul.mubr.f32.vlgmr.msra.gmra.mrb[4].mxu0 %v10418_v31 }
 0xa27   :  { %9020 = vmatpush3.bf16.msra.mxu0 %v9418_v13  ;;  %7832 = vmatprep.mubr.msk.f32.mxu0 %vm9332_vm0, %v9333_v46 }
 0xa28   :  { %9021 = vmatprep.subr.bf16.mxu0 %v9330_v1 }
 0xa2b   :  { %9023 = vmatpush3.bf16.msra.mxu0 %v9425_v14 }
 0xa2c   :  { %9024 = vmatprep.subr.bf16.mxu0 %v9330_v1 }
 0xa2f   :  { %9026 = vmatpush3.bf16.msra.mxu0 %v9444_v19 }
 0xa30   :  { %9027 = vmatprep.subr.bf16.mxu0 %v9330_v1 }
 0xa33   :  { %9029 = vmatpush3.bf16.msra.mxu0 %v9460_v25 }
 0xa34   :  { %9030 = vmatprep.subr.bf16.mxu0 %v9330_v1 }
 0xa37   :  { %9032 = vmatpush3.bf16.msra.mxu0 %v9477_v30 }
 0xa38   :  { %9033 = vmatprep.subr.bf16.mxu0 %v9330_v1 }
 0xa3b   :  { %9035 = vmatpush3.bf16.msra.mxu0 %v9493_v35 }
 0xa3c   :  { %9036 = vmatprep.subr.bf16.mxu0 %v9330_v1 }
 0xa3f   :  { %9038 = vmatpush3.bf16.msra.mxu0 %v9509_v40 }
 0xa40   :  { %9039 = vmatprep.subr.bf16.mxu0 %v9330_v1 }
 0xa43   :  { %9041 = vmatpush3.bf16.msra.mxu0 %v9538_v49 }
 0xa44   :  { %9042 = vmatprep.subr.bf16.mxu0 %v9330_v1 }
 0xaf9   :  { %v4104_v45 = vpop.f32.mrb[4].mxu0 }
 0xafa   :  { %9262 = vlog2.f32 %v4104_v45  ;;  %v7589_v55 = vpop.f32.mrb[5].mxu0 }
 0xb04   :  { %v9263_v26 = vpop.eup %9262 }
 0xb05   :  { %v4110_v44 = vmul.f32 0.6931472, %v9263_v26 }
 0xb07   :  { %v4116_v62 = vadd.f32 %v4114_v50, %v4110_v44 }
 0xb09   :  { %v4117_v63 = vadd.f32 %v4116_v62, %v3461_v54 }
 0xb0b   :  { %v10533_v4 = vsel %vm4125_vm10, %v4117_v63, %v10411_v5  ;;  %v5469_v63 = vsel %vm5468_vm13, 1, %v9331_v22 }
 0xb0c   :  { %4136 = vmax.xlane.f32.xlu0 %v10533_v4 }
 0xb99   :  { %v4137_v8 = vpop.xlane.xlu0 %4136 }
 0xb9a   :  { %v4138_v12 = vsub.f32 %v10533_v4, %v4137_v8  ;;  %v4782_v41 = vadd.f32 %v10286_v32, %v4137_v8 }
 0xb9c   :  { %v4139_v28 = vmul.f32 1.442695, %v4138_v12  ;;  %4787 = vperm.xlu1 %9240, %v4782_v41  }
 0xb9e   :  { %9264 = vpow2.f32 %v4139_v28 }
 0xba0   :  { %4797 = vperm.xlu1 %9240, %v4795_v15  }
 0xba8   :  { %v9265_v20 = vpop.eup %9264 }
 0xba9   :  { %v10540_v21 = vand.u32 4294901760, %v9265_v20 }
 0xbab   :  { %v4223_v5 = vsub.f32 %v9265_v20, %v10540_v21 }
 0xbad   :  { %v4224_v52 = vand.u32 4294901760, %v4223_v5 }
 0xbaf   :  { %v4225_v27 = vsub.f32 %v4223_v5, %v4224_v52 }
 0xbb1   :  { %v4226_v29 = vand.u32 4294901760, %v4225_v27 }
 0xbb3   :  { %7623 = vmatmul.mubr.f32.vlgmr.msra.gmra.mrb[16].mxu1 %v4226_v29 }
 0xbb4   :  { %8900 = vmatpush3.bf16.msra.mxu1 %v9565_v59  ;;  %7657 = vmatprep.mubr.msk.f32.mxu1 %vm9332_vm0, %v9333_v46 }
 0xbb5   :  { %8901 = vmatprep.subr.bf16.mxu1 %v9330_v1 }
 0xbb8   :  { %8903 = vmatpush3.bf16.msra.mxu1 %v9585_v6 }
 0xbb9   :  { %8904 = vmatprep.subr.bf16.mxu1 %v9330_v1 }
 0xbbc   :  { %8906 = vmatpush3.bf16.msra.mxu1 %v9621_v23 }
 0xbbd   :  { %8907 = vmatprep.subr.bf16.mxu1 %v9330_v1 }
 0xbc0   :  { %8909 = vmatpush3.bf16.msra.mxu1 %v9625_v56 }
 0xbc1   :  { %8910 = vmatprep.subr.bf16.mxu1 %v9330_v1 }
 0xbc4   :  { %8912 = vmatpush3.bf16.msra.mxu1 %v9645_v7 }
 0xbc5   :  { %8913 = vmatprep.subr.bf16.mxu1 %v9330_v1 }
 0xbc8   :  { %8915 = vmatpush3.bf16.msra.mxu1 %v9681_v18 }
 0xbc9   :  { %8916 = vmatprep.subr.bf16.mxu1 %v9330_v1 }
 0xbcc   :  { %8918 = vmatpush3.bf16.msra.mxu1 %v9685_v60 }
 0xbcd   :  { %8919 = vmatprep.subr.bf16.mxu1 %v9330_v1 }
 0xbd0   :  { %8921 = vmatpush3.bf16.msra.mxu1 %v9693_v61 }
 0xbd1   :  { %8922 = vmatprep.subr.bf16.mxu1 %v9330_v1 }
 0xbd3   :  { %7658 = vmatmul.mubr.f32.vlgmr.msra.gmra.mrb[16].mxu1 %v10540_v21 }
 0xbd4   :  { %8924 = vmatpush3.bf16.msra.mxu1 %v9697_v10  ;;  %7692 = vmatprep.mubr.msk.f32.mxu1 %vm9332_vm0, %v9333_v46 }
 0xbd5   :  { %8925 = vmatprep.subr.bf16.mxu1 %v9330_v1 }
 0xbd8   :  { %8927 = vmatpush3.bf16.msra.mxu1 %v9701_v33 }
 0xbd9   :  { %8928 = vmatprep.subr.bf16.mxu1 %v9330_v1 }
 0xbdc   :  { %8930 = vmatpush3.bf16.msra.mxu1 %v9705_v34 }
 0xbdd   :  { %8931 = vmatprep.subr.bf16.mxu1 %v9330_v1 }
 0xbe0   :  { %8933 = vmatpush3.bf16.msra.mxu1 %v9709_v17 }
 0xbe1   :  { %8934 = vmatprep.subr.bf16.mxu1 %v9330_v1 }
 0xbe4   :  { %8936 = vmatpush3.bf16.msra.mxu1 %v9713_v36 }
 0xbe5   :  { %8937 = vmatprep.subr.bf16.mxu1 %v9330_v1 }
 0xbe8   :  { %8939 = vmatpush3.bf16.msra.mxu1 %v9717_v38 }
 0xbe9   :  { %8940 = vmatprep.subr.bf16.mxu1 %v9330_v1 }
 0xbec   :  { %8942 = vmatpush3.bf16.msra.mxu1 %v9721_v24 }
 0xbed   :  { %8943 = vmatprep.subr.bf16.mxu1 %v9330_v1 }
 0xbf0   :  { %8945 = vmatpush3.bf16.msra.mxu1 %v9725_v51 }
 0xbf1   :  { %8946 = vmatprep.subr.bf16.mxu1 %v9330_v1 }
 0xbf3   :  { %7693 = vmatmul.mubr.f32.vlgmr.msra.gmra.mrb[16].mxu1 %v4223_v5 }
 0xbf4   :  { %8948 = vmatpush3.bf16.msra.mxu1 %v9418_v13  ;;  %7727 = vmatprep.mubr.msk.f32.mxu1 %vm9332_vm0, %v9333_v46 }
 0xbf5   :  { %8949 = vmatprep.subr.bf16.mxu1 %v9330_v1 }
 0xbf8   :  { %8951 = vmatpush3.bf16.msra.mxu1 %v9425_v14 }
 0xbf9   :  { %8952 = vmatprep.subr.bf16.mxu1 %v9330_v1 }
 0xbfc   :  { %8954 = vmatpush3.bf16.msra.mxu1 %v9444_v19 }
 0xbfd   :  { %8955 = vmatprep.subr.bf16.mxu1 %v9330_v1 }
 0xc00   :  { %8957 = vmatpush3.bf16.msra.mxu1 %v9460_v25 }
 0xc01   :  { %8958 = vmatprep.subr.bf16.mxu1 %v9330_v1 }
 0xc04   :  { %8960 = vmatpush3.bf16.msra.mxu1 %v9477_v30 }
 0xc05   :  { %8961 = vmatprep.subr.bf16.mxu1 %v9330_v1 }
 0xc08   :  { %8963 = vmatpush3.bf16.msra.mxu1 %v9493_v35 }
 0xc09   :  { %8964 = vmatprep.subr.bf16.mxu1 %v9330_v1 }
 0xc0c   :  { %8966 = vmatpush3.bf16.msra.mxu1 %v9509_v40 }
 0xc0d   :  { %8967 = vmatprep.subr.bf16.mxu1 %v9330_v1 }
 0xc10   :  { %8969 = vmatpush3.bf16.msra.mxu1 %v9538_v49 }
 0xc11   :  { %8970 = vmatprep.subr.bf16.mxu1 %v9330_v1 }
 0xc13   :  { %7728 = vmatmul.mubr.f32.vlgmr.msra.gmra.mrb[16].mxu1 %v4224_v52 }
 0xc14   :  { %8972 = vmatpush3.bf16.msra.mxu1 %v9838_v42  ;;  %7762 = vmatprep.mubr.msk.f32.mxu1 %vm9332_vm0, %v9333_v46 }
 0xc15   :  { %8973 = vmatprep.subr.bf16.mxu1 %v9330_v1 }
 0xc18   :  { %8975 = vmatpush3.bf16.msra.mxu1 %v9850_v43 }
 0xc19   :  { %8976 = vmatprep.subr.bf16.mxu1 %v9330_v1 }
 0xc1b   :  { %v4788_v0 = vpop.permute.xlu1 %4787 }
 0xc1c   :  { %8978 = vmatpush3.bf16.msra.mxu1 %v9862_v47 }
 0xc1d   :  { %8979 = vmatprep.subr.bf16.mxu1 %v9330_v1 }
 0xc1f   :  { %v4798_v45 = vpop.permute.xlu1 %4797 }
 0xc20   :  { %8981 = vmatpush3.bf16.msra.mxu1 %v9872_v48  ;;  %vm4799_vm12 = vcmp.eq.s32.totalorder %v4798_v45, 1 }
 0xc21   :  { %8982 = vmatprep.subr.bf16.mxu1 %v9330_v1 }
 0xc24   :  { %8984 = vmatpush3.bf16.msra.mxu1 %v9882_v53 }
 0xc25   :  { %8985 = vmatprep.subr.bf16.mxu1 %v9330_v1 }
 0xc28   :  { %8987 = vmatpush3.bf16.msra.mxu1 %v9892_v58 }
 0xc29   :  { %8988 = vmatprep.subr.bf16.mxu1 %v9330_v1 }
 0xc2c   :  { %8990 = vmatpush3.bf16.msra.mxu1 %v9902_v3 }
 0xc2d   :  { %8991 = vmatprep.subr.bf16.mxu1 %v9330_v1 }
 0xc30   :  { %8993 = vmatpush3.bf16.msra.mxu1 %v9912_v9 }
 0xc31   :  { %8994 = vmatprep.subr.bf16.mxu1 %v9330_v1 }
 0xc33   :  { %7763 = vmatmul.mubr.f32.vlgmr.msra.gmra.mrb[16].mxu1 %v10540_v21 }
 0xc34   :  { %8996 = vmatpush3.bf16.msra.mxu1 %v9418_v13  ;;  %7797 = vmatprep.mubr.msk.f32.mxu1 %vm9332_vm0, %v9333_v46 }
 0xc35   :  { %8997 = vmatprep.subr.bf16.mxu1 %v9330_v1 }
 0xc38   :  { %8999 = vmatpush3.bf16.msra.mxu1 %v9425_v14 }
 0xc39   :  { %9000 = vmatprep.subr.bf16.mxu1 %v9330_v1 }
 0xc3c   :  { %9002 = vmatpush3.bf16.msra.mxu1 %v9444_v19 }
 0xc3d   :  { %9003 = vmatprep.subr.bf16.mxu1 %v9330_v1 }
 0xc40   :  { %9005 = vmatpush3.bf16.msra.mxu1 %v9460_v25 }
 0xc41   :  { %9006 = vmatprep.subr.bf16.mxu1 %v9330_v1 }
 0xc44   :  { %9008 = vmatpush3.bf16.msra.mxu1 %v9477_v30 }
 0xc45   :  { %9009 = vmatprep.subr.bf16.mxu1 %v9330_v1 }
 0xc48   :  { %9011 = vmatpush3.bf16.msra.mxu1 %v9493_v35 }
 0xc49   :  { %9012 = vmatprep.subr.bf16.mxu1 %v9330_v1 }
 0xc4c   :  { %9014 = vmatpush3.bf16.msra.mxu1 %v9509_v40 }
 0xc4d   :  { %9015 = vmatprep.subr.bf16.mxu1 %v9330_v1 }
 0xc50   :  { %9017 = vmatpush3.bf16.msra.mxu1 %v9538_v49 }
 0xc53   :  { %7798 = vmatmul.mubr.f32.vlgmr.msra.gmra.mrb[16].mxu1 %v10540_v21 }
 0xd26   :  { %v4778_v2 = vpop.f32.mrb[16].mxu1 }
 0xd27   :  { %9266 = vlog2.f32 %v4778_v2  ;;  %v7799_v31 = vpop.f32.mrb[17].mxu1 }
 0xd31   :  { %v9267_v11 = vpop.eup %9266 }
 0xd32   :  { %v4784_v37 = vmul.f32 0.6931472, %v9267_v11 }
 0xd34   :  { %v4790_v55 = vadd.f32 %v4788_v0, %v4784_v37 }
 0xd36   :  { %v4791_v26 = vadd.f32 %v4790_v55, %v4135_v39 }
 0xd38   :  { %v10636_v44 = vsel %vm4799_vm12, %v4791_v26, %v10533_v4 }
 0xd39   :  { %4810 = vmax.xlane.f32.xlu1 %v10636_v44 }
 0xdc6   :  { %v4811_v50 = vpop.xlane.xlu1 %4810 }
 0xdc7   :  { %v4812_v54 = vsub.f32 %v10636_v44, %v4811_v50  ;;  %v5456_v57 = vadd.f32 %v10286_v32, %v4811_v50 }
 0xdc9   :  { %v4813_v62 = vmul.f32 1.442695, %v4812_v54  ;;  %5461 = vperm.xlu0 %9241, %v5456_v57  }
 0xdcb   :  { %9268 = vpow2.f32 %v4813_v62 }
 0xdcd   :  { %5471 = vperm.xlu0 %9241, %v5469_v63  }
 0xdd5   :  { %v9269_v8 = vpop.eup %9268 }
 0xdd6   :  { %v10643_v12 = vand.u32 4294901760, %v9269_v8 }
 0xdd8   :  { %v4897_v4 = vsub.f32 %v9269_v8, %v10643_v12 }
 0xdda   :  { %v4898_v41 = vand.u32 4294901760, %v4897_v4 }
 0xddc   :  { %v4899_v28 = vsub.f32 %v4897_v4, %v4898_v41 }
 0xdde   :  { %v4900_v15 = vand.u32 4294901760, %v4899_v28 }
 0xde0   :  { %7833 = vmatmul.mubr.f32.vlgmr.msra.gmra.mrb[6].mxu0 %v4900_v15 }
 0xde1   :  { %9044 = vmatpush3.bf16.msra.mxu0 %v9565_v59  ;;  %7867 = vmatprep.mubr.msk.f32.mxu0 %vm9332_vm0, %v9333_v46 }
 0xde2   :  { %9045 = vmatprep.subr.bf16.mxu0 %v9330_v1 }
 0xde5   :  { %9047 = vmatpush3.bf16.msra.mxu0 %v9585_v6 }
 0xde6   :  { %9048 = vmatprep.subr.bf16.mxu0 %v9330_v1 }
 0xde9   :  { %9050 = vmatpush3.bf16.msra.mxu0 %v9621_v23 }
 0xdea   :  { %9051 = vmatprep.subr.bf16.mxu0 %v9330_v1 }
 0xded   :  { %9053 = vmatpush3.bf16.msra.mxu0 %v9625_v56 }
 0xdee   :  { %9054 = vmatprep.subr.bf16.mxu0 %v9330_v1 }
 0xdf1   :  { %9056 = vmatpush3.bf16.msra.mxu0 %v9645_v7 }
 0xdf2   :  { %9057 = vmatprep.subr.bf16.mxu0 %v9330_v1 }
 0xdf5   :  { %9059 = vmatpush3.bf16.msra.mxu0 %v9681_v18 }
 0xdf6   :  { %9060 = vmatprep.subr.bf16.mxu0 %v9330_v1 }
 0xdf9   :  { %9062 = vmatpush3.bf16.msra.mxu0 %v9685_v60 }
 0xdfa   :  { %9063 = vmatprep.subr.bf16.mxu0 %v9330_v1 }
 0xdfd   :  { %9065 = vmatpush3.bf16.msra.mxu0 %v9693_v61 }
 0xdfe   :  { %9066 = vmatprep.subr.bf16.mxu0 %v9330_v1 }
 0xe00   :  { %7868 = vmatmul.mubr.f32.vlgmr.msra.gmra.mrb[6].mxu0 %v10643_v12 }
 0xe01   :  { %9068 = vmatpush3.bf16.msra.mxu0 %v9697_v10  ;;  %7902 = vmatprep.mubr.msk.f32.mxu0 %vm9332_vm0, %v9333_v46 }
 0xe02   :  { %9069 = vmatprep.subr.bf16.mxu0 %v9330_v1 }
 0xe05   :  { %9071 = vmatpush3.bf16.msra.mxu0 %v9701_v33 }
 0xe06   :  { %9072 = vmatprep.subr.bf16.mxu0 %v9330_v1 }
 0xe09   :  { %9074 = vmatpush3.bf16.msra.mxu0 %v9705_v34 }
 0xe0a   :  { %9075 = vmatprep.subr.bf16.mxu0 %v9330_v1 }
 0xe0d   :  { %9077 = vmatpush3.bf16.msra.mxu0 %v9709_v17 }
 0xe0e   :  { %9078 = vmatprep.subr.bf16.mxu0 %v9330_v1 }
 0xe11   :  { %9080 = vmatpush3.bf16.msra.mxu0 %v9713_v36 }
 0xe12   :  { %9081 = vmatprep.subr.bf16.mxu0 %v9330_v1 }
 0xe15   :  { %9083 = vmatpush3.bf16.msra.mxu0 %v9717_v38 }
 0xe16   :  { %9084 = vmatprep.subr.bf16.mxu0 %v9330_v1 }
 0xe19   :  { %9086 = vmatpush3.bf16.msra.mxu0 %v9721_v24 }
 0xe1a   :  { %9087 = vmatprep.subr.bf16.mxu0 %v9330_v1 }
 0xe1d   :  { %9089 = vmatpush3.bf16.msra.mxu0 %v9725_v51 }
 0xe1e   :  { %9090 = vmatprep.subr.bf16.mxu0 %v9330_v1 }
 0xe20   :  { %7903 = vmatmul.mubr.f32.vlgmr.msra.gmra.mrb[6].mxu0 %v4897_v4 }
 0xe21   :  { %9092 = vmatpush3.bf16.msra.mxu0 %v9418_v13  ;;  %7937 = vmatprep.mubr.msk.f32.mxu0 %vm9332_vm0, %v9333_v46 }
 0xe22   :  { %9093 = vmatprep.subr.bf16.mxu0 %v9330_v1 }
 0xe25   :  { %9095 = vmatpush3.bf16.msra.mxu0 %v9425_v14 }
 0xe26   :  { %9096 = vmatprep.subr.bf16.mxu0 %v9330_v1 }
 0xe29   :  { %9098 = vmatpush3.bf16.msra.mxu0 %v9444_v19 }
 0xe2a   :  { %9099 = vmatprep.subr.bf16.mxu0 %v9330_v1 }
 0xe2d   :  { %9101 = vmatpush3.bf16.msra.mxu0 %v9460_v25 }
 0xe2e   :  { %9102 = vmatprep.subr.bf16.mxu0 %v9330_v1 }
 0xe31   :  { %9104 = vmatpush3.bf16.msra.mxu0 %v9477_v30 }
 0xe32   :  { %9105 = vmatprep.subr.bf16.mxu0 %v9330_v1 }
 0xe35   :  { %9107 = vmatpush3.bf16.msra.mxu0 %v9493_v35 }
 0xe36   :  { %9108 = vmatprep.subr.bf16.mxu0 %v9330_v1 }
 0xe39   :  { %9110 = vmatpush3.bf16.msra.mxu0 %v9509_v40 }
 0xe3a   :  { %9111 = vmatprep.subr.bf16.mxu0 %v9330_v1 }
 0xe3d   :  { %9113 = vmatpush3.bf16.msra.mxu0 %v9538_v49 }
 0xe3e   :  { %9114 = vmatprep.subr.bf16.mxu0 %v9330_v1 }
 0xe40   :  { %7938 = vmatmul.mubr.f32.vlgmr.msra.gmra.mrb[6].mxu0 %v4898_v41 }
 0xe41   :  { %9116 = vmatpush3.bf16.msra.mxu0 %v9838_v42  ;;  %7972 = vmatprep.mubr.msk.f32.mxu0 %vm9332_vm0, %v9333_v46 }
 0xe42   :  { %9117 = vmatprep.subr.bf16.mxu0 %v9330_v1 }
 0xe45   :  { %9119 = vmatpush3.bf16.msra.mxu0 %v9850_v43 }
 0xe46   :  { %9120 = vmatprep.subr.bf16.mxu0 %v9330_v1 }
 0xe49   :  { %9122 = vmatpush3.bf16.msra.mxu0 %v9862_v47 }
 0xe4a   :  { %9123 = vmatprep.subr.bf16.mxu0 %v9330_v1 }
 0xe4d   :  { %9125 = vmatpush3.bf16.msra.mxu0 %v9872_v48 }
 0xe4e   :  { %9126 = vmatprep.subr.bf16.mxu0 %v9330_v1 }
 0xe51   :  { %9128 = vmatpush3.bf16.msra.mxu0 %v9882_v53 }
 0xe52   :  { %9129 = vmatprep.subr.bf16.mxu0 %v9330_v1 }
 0xe55   :  { %9131 = vmatpush3.bf16.msra.mxu0 %v9892_v58 }
 0xe56   :  { %9132 = vmatprep.subr.bf16.mxu0 %v9330_v1 }
 0xe59   :  { %9134 = vmatpush3.bf16.msra.mxu0 %v9902_v3 }
 0xe5a   :  { %9135 = vmatprep.subr.bf16.mxu0 %v9330_v1 }
 0xe5d   :  { %9137 = vmatpush3.bf16.msra.mxu0 %v9912_v9 }
 0xe5e   :  { %9138 = vmatprep.subr.bf16.mxu0 %v9330_v1 }
 0xe60   :  { %7973 = vmatmul.mubr.f32.vlgmr.msra.gmra.mrb[6].mxu0 %v10643_v12 }
 0xe61   :  { %9140 = vmatpush3.bf16.msra.mxu0 %v9418_v13  ;;  %8007 = vmatprep.mubr.msk.f32.mxu0 %vm9332_vm0, %v9333_v46 }
 0xe62   :  { %9141 = vmatprep.subr.bf16.mxu0 %v9330_v1 }
 0xe65   :  { %9143 = vmatpush3.bf16.msra.mxu0 %v9425_v14 }
 0xe66   :  { %9144 = vmatprep.subr.bf16.mxu0 %v9330_v1 }
 0xe69   :  { %9146 = vmatpush3.bf16.msra.mxu0 %v9444_v19  ;;  %v5462_v19 = vpop.permute.xlu0 %5461 }
 0xe6a   :  { %9147 = vmatprep.subr.bf16.mxu0 %v9330_v1 }
 0xe6d   :  { %9149 = vmatpush3.bf16.msra.mxu0 %v9460_v25  ;;  %v5472_v46 = vpop.permute.xlu0 %5471 }
 0xe6e   :  { %9150 = vmatprep.subr.bf16.mxu0 %v9330_v1  ;;  %vm5473_vm14 = vcmp.eq.s32.totalorder %v5472_v46, 1 }
 0xe71   :  { %9152 = vmatpush3.bf16.msra.mxu0 %v9477_v30  ;;  %v4809_v30 = vld [vmem:[#allocation4 + $0x38] sm:$0xff] }
 0xe72   :  { %9153 = vmatprep.subr.bf16.mxu0 %v9330_v1 }
 0xe75   :  { %9155 = vmatpush3.bf16.msra.mxu0 %v9493_v35 }
 0xe76   :  { %9156 = vmatprep.subr.bf16.mxu0 %v9330_v1 }
 0xe79   :  { %9158 = vmatpush3.bf16.msra.mxu0 %v9509_v40  ;;  %v5513_v40 = vld [vmem:[%s10749_s4] ss:$0 sm:$0xff] }
 0xe7a   :  { %9159 = vmatprep.subr.bf16.mxu0 %v9330_v1 }
 0xe7d   :  { %9161 = vmatpush3.bf16.msra.mxu0 %v9538_v49 }
 0xe80   :  { %8008 = vmatmul.mubr.f32.vlgmr.msra.gmra.mrb[6].mxu0 %v10643_v12 }
 0xf53   :  { %v5452_v13 = vpop.f32.mrb[6].mxu0 }
 0xf54   :  { %9270 = vlog2.f32 %v5452_v13  ;;  %v8009_v14 = vpop.f32.mrb[7].mxu0 }
 0xf5e   :  { %v9271_v22 = vpop.eup %9270 }
 0xf5f   :  { %v5458_v25 = vmul.f32 0.6931472, %v9271_v22 }
 0xf61   :  { %v5464_v59 = vadd.f32 %v5462_v19, %v5458_v25 }
 0xf63   :  { %v5465_v35 = vadd.f32 %v5464_v59, %v4809_v30 }
 0xf65   :  { %v5474_v1 = vsel %vm5473_vm14, %v5465_v35, %v10636_v44 }
 0xf66   :  { %v5492_v49 = vadd.f32 %v5513_v40, %v5474_v1 }
 0xf68   :  { %5493 = vmax.xlane.f32.xlu0 %v5492_v49 }
 0xff5   :  { %v5494_v6 = vpop.xlane.xlu0 %5493 }
 0xff6   :  { %v5495_v23 = vsub.f32 %v5492_v49, %v5494_v6 }
 0xff8   :  { %v5496_v56 = vmul.f32 1.442695, %v5495_v23 }
 0xffa   :  { %9272 = vpow2.f32 %v5496_v56 }
0x1004   :  { %v9273_v7 = vpop.eup %9272 }
0x1005   :  { %5498 = vadd.xlane.f32.xlu1 %v9273_v7 }
0x1092   :  { %v5499_v18 = vpop.xlane.xlu1 %5498 }
0x1093   :  { %9274 = vlog2.f32 %v5499_v18 }
0x109d   :  { %v9275_v60 = vpop.eup %9274 }
0x109e   :  { %v5501_v61 = vmul.f32 0.6931472, %v9275_v60 }
0x10a0   :  { %v5502_v10 = vadd.f32 %v5501_v61, %v5494_v6 }
0x10a2   :  { %5504 = vst.msk [vmem:[%s10751_s6] sm:$0xff] %vm5503_vm15, %v5502_v10 }
0x10a3   :  { %5509 = vsyncpa [#allocation5], 1 }
0x10a4   :  { %5510 = vsyncpa [#allocation7], 1 }

</bundles_post_ra>
